<compile_context>
chip_gen: v5e
topology: v5e:2x2
jax: 0.10.0
libtpu: 0.0.40
codegen_flags: <defaults>
</compile_context>

<pallas_src>
import math
import functools

import jax
import jax.numpy as jnp
from jax.scipy.linalg import block_diag
from jax.experimental import pallas as pl

# ----------------------- model hyper-parameters (small) -----------------------
HIDDEN = 32
EDGE_CH = 4
ECP = 8                              # edge channels padded to a sublane multiple (zero rows/cols)
INPUT_DIM_LIST = [8, 8, 8]           # 3 modalities, in_channels = 24
NHEAD = 2
NLAYER = 1                           # transformer encoder layers per fusion block
NUM_LAYERS = 2                       # message-passing layers (as in reference)
M = len(INPUT_DIM_LIST)
HM = M * HIDDEN                      # fused lane width (96)
DIN = sum(INPUT_DIM_LIST)            # 24


# ------------------------------ slab packing ----------------------------------
def _pack(entries, width, align=8):
    """Stack 2-D arrays along rows into one lane-padded slab.

    Returns (slab, {name: (row_start, true_rows)}).  Row starts are 8-aligned so
    in-kernel slices never need sublane-shift relayouts.
    """
    offs, blocks, cur = {}, [], 0
    for name, m in entries:
        m = jnp.asarray(m, jnp.float32)
        r, c = m.shape
        m = jnp.pad(m, ((0, (-r) % align), (0, width - c)))
        offs[name] = (cur, r)
        blocks.append(m)
        cur += m.shape[0]
    return jnp.concatenate(blocks, axis=0), offs


# ------------------------------- fused kernel ----------------------------------
def _fused_kernel(slabA_ref, slabB_ref, bias_ref, g_ref, o_ref, *,
                  offA, offB, offBias, offG, n, n1, n2):
    H, Mm = HIDDEN, M
    fdot = functools.partial(jnp.dot, preferred_element_type=jnp.float32)

    def A(name):
        s, r = offA[name]
        return slabA_ref[s:s + r, :]

    def Bw(name):
        s, r = offB[name]
        return slabB_ref[s:s + r, :]

    def bias(name):
        s, _ = offBias[name]
        return bias_ref[s:s + 1, :]

    def G(name, rows, cols):
        s, _ = offG[name]
        return g_ref[s:s + rows, 0:cols]

    # ---- graph operands (one slab DMA; everything stays in vregs) ----
    x = G('x', n, DIN)                       # [N, 24]   modality k in lanes 8k:8k+8
    A0 = G('A0', n1, n)                      # [N1, N]   row-normalized adjacency (layer 0)
    A1 = G('A1', n2, n1)                     # [N2, N1]  row-normalized adjacency (layer 1)
    Agcn = G('Agcn', n1, n1)                 # [N1, N1]  summary-GCN mean adjacency (+self loops)
    agg_e0 = G('e0', n1, ECP)                # [N1, 8]   mean edge attrs (zero-padded 4->8)
    agg_e1 = G('e1', n2, ECP)                # [N2, 8]

    SEG16 = A('SEG16')                       # [96,96] ones on 16x16 diag blocks (block x head)
    SEG32 = A('SEG32')                       # [96,96] ones on 32x32 diag blocks (per token)

    # ---- IntraModalGraphConv fused over the 3 modalities (block-diag weights) ----
    def intra_fused(pref, x_src, x_dst, adj, agg_e, relu_out):
        h_src = fdot(x_src, A(pref + 'nw')) + bias(pref + 'nb')
        agg_h = fdot(adj, h_src)                                   # mean neighborhood agg
        out = (fdot(agg_h, A(pref + 'Wm')) + fdot(agg_e, A(pref + 'We'))
               + fdot(x_dst, A(pref + 'Wr')) + bias(pref + 'cb'))
        ssq = fdot(out * out, SEG32)                               # per-modality ||.||^2, lane-bcast
        out = out * jax.lax.rsqrt(jnp.maximum(ssq, 1e-24))         # normalize=True
        if relu_out:
            out = jnp.maximum(out, 0.0)
        return out

    # layer 0 of conv2 (relu; eval-mode dropout is identity)
    emb2 = intra_fused('c2l0_', x, x[0:n1, :], A0, agg_e0, relu_out=True)          # [N1, 96]
    # summary GCN (mean aggregation + self loops) over the layer-1 node set
    summ = fdot(fdot(Agcn, emb2), A('Wgcn')) + bias('gcn_b')                        # [N1, 96]
    # layer 1 of conv2
    emb2 = intra_fused('c2l1_', emb2, emb2[0:n2, :], A1, agg_e1, relu_out=False)    # [N2, 96]
    # conv1 on the layer-1 graph
    emb1 = intra_fused('c1_', x[0:n1, :], x[0:n2, :], A1, agg_e1, relu_out=False)   # [N2, 96]
    summ = summ[0:n2, :]

    # ---- relayout once: (node rows, modality lanes) -> (modality*node rows, 32 feat lanes),
    #      then stack the 3 independent fusion blocks along lanes -> [3*N2, 96] ----
    def to_rows(e):
        return jnp.concatenate([e[:, m * H:(m + 1) * H] for m in range(Mm)], axis=0)

    flat = jnp.concatenate([to_rows(emb1), to_rows(emb2), to_rows(summ)], axis=1)   # [3*N2, 96]

    def seg_layernorm(z, gg, bb, eps=1e-5):
        mu = fdot(z, SEG32) * (1.0 / H)
        d = z - mu
        var = fdot(d * d, SEG32) * (1.0 / H)
        return d * jax.lax.rsqrt(var + eps) * gg + bb

    # ---- InterModalFusion x3 (lane-fused): transformer encoder over the modality axis ----
    for l in range(NLAYER):
        p = 'f%d_' % l
        q = fdot(flat, A(p + 'Wq')) + bias(p + 'bq')   # 1/sqrt(dh) folded at pack time
        k = fdot(flat, A(p + 'Wk')) + bias(p + 'bk')
        v = fdot(flat, A(p + 'Wv')) + bias(p + 'bv')
        scs, vts = [], []
        for mp in range(Mm):
            k_mp = k[mp * n2:(mp + 1) * n2, :]
            v_mp = v[mp * n2:(mp + 1) * n2, :]
            k_t = jnp.concatenate([k_mp] * Mm, axis=0)
            vts.append(jnp.concatenate([v_mp] * Mm, axis=0))
            scs.append(fdot(q * k_t, SEG16))           # per-(block, head) scores, lane-broadcast
        smax = scs[0]
        for s in scs[1:]:
            smax = jnp.maximum(smax, s)
        es = [jnp.exp(s - smax) for s in scs]
        denom = es[0]
        for e in es[1:]:
            denom = denom + e
        inv = 1.0 / denom                               # exact softmax (parity with reference)
        attn = (es[0] * inv) * vts[0]
        for mp in range(1, Mm):
            attn = attn + (es[mp] * inv) * vts[mp]
        attn = fdot(attn, A(p + 'Wo')) + bias(p + 'bo')
        flat = seg_layernorm(flat + attn, bias(p + 'g1'), bias(p + 'b1'))
        ff = jnp.maximum(fdot(flat, Bw(p + 'Wf1')) + Bw(p + 'bf1'), 0.0)
        ff = fdot(ff, A(p + 'Wf2')) + bias(p + 'bf2')
        flat = seg_layernorm(flat + ff, bias(p + 'g2'), bias(p + 'b2'))

    # TODO(synk): InterModalFusion's modality pooling is unspecified in the reference;
    # use mean over the 3 modality tokens.
    pooled = flat[0:n2, :]
    for m in range(1, Mm):
        pooled = pooled + flat[m * n2:(m + 1) * n2, :]
    pooled = pooled * (1.0 / Mm)                        # [N2, 96] lanes = the 3 fusion outputs

    # ---- multi-modal multi-scale attention pooling over the 3 fusion outputs ----
    hpool = jnp.tanh(fdot(pooled, A('W1pool')) + bias('b1pool'))
    s = fdot(hpool * bias('w2pool'), SEG32) + bias('b2pool')   # per-scale score, lane-broadcast
    smax = jnp.max(s, axis=-1, keepdims=True)                  # max over the 3 scales
    e = jnp.exp(s - smax)
    denom = jnp.sum(e, axis=-1, keepdims=True) * (1.0 / H)     # each score broadcast over H lanes
    wr = (e / denom) * pooled
    res = wr[:, 0:H]
    for b in range(1, Mm):
        res = res + wr[:, b * H:(b + 1) * H]
    o_ref[...] = res


# ------------------------------- parameters -----------------------------------
def make_params(seed=0):
    base = jax.random.PRNGKey(seed)
    counter = [0]

    def nxt():
        counter[0] += 1
        return jax.random.fold_in(base, counter[0])

    def randn(shape, scale=0.1):
        return scale * jax.random.normal(nxt(), shape, jnp.float32)

    def intra(c_in):
        # IntraModalGraphConv((HIDDEN + EDGE_CH, c_in), HIDDEN, normalize=True)
        # w_comb rows pack [W_msg ; W_edge ; W_root].
        return {"node_w": randn((c_in, HIDDEN)),
                "node_b": randn((1, HIDDEN)),
                "w_comb": randn((HIDDEN + EDGE_CH + c_in, HIDDEN)),
                "b_comb": randn((1, HIDDEN))}

    def enc_layer():
        return {"w_qkv": randn((HIDDEN, 3 * HIDDEN)), "b_qkv": randn((1, 3 * HIDDEN)),
                "w_o": randn((HIDDEN, HIDDEN)), "b_o": randn((1, HIDDEN)),
                "g1": randn((1, HIDDEN)) + 1.0, "b1": randn((1, HIDDEN)),
                "w_f1": randn((HIDDEN, 2 * HIDDEN)), "b_f1": randn((1, 2 * HIDDEN)),
                "w_f2": randn((2 * HIDDEN, HIDDEN)), "b_f2": randn((1, HIDDEN)),
                "g2": randn((1, HIDDEN)) + 1.0, "b2": randn((1, HIDDEN))}

    def fusion():
        return {"layers": [enc_layer() for _ in range(NLAYER)]}

    return {
        "conv2": [[intra(INPUT_DIM_LIST[k]), intra(HIDDEN)] for k in range(M)],
        "conv1": [intra(INPUT_DIM_LIST[k]) for k in range(M)],
        "gcn": [{"w": randn((HIDDEN, HIDDEN)), "b": randn((1, HIDDEN))} for _ in range(M)],
        "fusion1": fusion(), "fusion2": fusion(), "fusion_sum": fusion(),
        # TODO(synk): reference builds nn.Linear(hidden*len(input_dim_list), hidden) but applies
        # it to a hidden-dim input; we use Linear(hidden, hidden) for shape consistency.
        "attn_w1": randn((HIDDEN, HIDDEN)), "attn_b1": randn((1, HIDDEN)),
        "attn_w2": randn((1, HIDDEN)), "attn_b2": randn((1, 1)),
    }


def pack_params(params):
    """One-time parameter transform: block-diagonal modality / fusion-block fusion + slab packing."""
    H, EC = HIDDEN, EDGE_CH
    scale = 1.0 / math.sqrt(H // NHEAD)
    wA, wB, bA = [], [], []

    def conv_entries(pref, pcs):
        We = jnp.concatenate([p['w_comb'][H:H + EC] for p in pcs], axis=1)
        wA.extend([
            (pref + 'nw', block_diag(*[p['node_w'] for p in pcs])),
            (pref + 'Wm', block_diag(*[p['w_comb'][:H] for p in pcs])),
            (pref + 'We', jnp.pad(We, ((0, ECP - EC), (0, 0)))),
            (pref + 'Wr', block_diag(*[p['w_comb'][H + EC:] for p in pcs])),
        ])
        bA.extend([
            (pref + 'nb', jnp.concatenate([p['node_b'] for p in pcs], axis=1)),
            (pref + 'cb', jnp.concatenate([p['b_comb'] for p in pcs], axis=1)),
        ])

    conv_entries('c2l0_', [params['conv2'][k][0] for k in range(M)])
    conv_entries('c2l1_', [params['conv2'][k][1] for k in range(M)])
    conv_entries('c1_',   [params['conv1'][k] for k in range(M)])
    wA.append(('Wgcn', block_diag(*[params['gcn'][k]['w'] for k in range(M)])))
    bA.append(('gcn_b', jnp.concatenate([params['gcn'][k]['b'] for k in range(M)], axis=1)))

    fusions = [params['fusion1'], params['fusion2'], params['fusion_sum']]
    for l in range(NLAYER):
        lps = [f['layers'][l] for f in fusions]
        p = 'f%d_' % l
        wA.extend([
            (p + 'Wq', block_diag(*[lp['w_qkv'][:, :H] * scale for lp in lps])),
            (p + 'Wk', block_diag(*[lp['w_qkv'][:, H:2 * H] for lp in lps])),
            (p + 'Wv', block_diag(*[lp['w_qkv'][:, 2 * H:] for lp in lps])),
            (p + 'Wo', block_diag(*[lp['w_o'] for lp in lps])),
            (p + 'Wf2', block_diag(*[lp['w_f2'] for lp in lps])),
        ])
        wB.extend([
            (p + 'Wf1', block_diag(*[lp['w_f1'] for lp in lps])),
            (p + 'bf1', jnp.concatenate([lp['b_f1'] for lp in lps], axis=1)),
        ])
        bA.extend([
            (p + 'bq', jnp.concatenate([lp['b_qkv'][:, :H] * scale for lp in lps], axis=1)),
            (p + 'bk', jnp.concatenate([lp['b_qkv'][:, H:2 * H] for lp in lps], axis=1)),
            (p + 'bv', jnp.concatenate([lp['b_qkv'][:, 2 * H:] for lp in lps], axis=1)),
            (p + 'bo', jnp.concatenate([lp['b_o'] for lp in lps], axis=1)),
            (p + 'g1', jnp.concatenate([lp['g1'] for lp in lps], axis=1)),
            (p + 'b1', jnp.concatenate([lp['b1'] for lp in lps], axis=1)),
            (p + 'bf2', jnp.concatenate([lp['b_f2'] for lp in lps], axis=1)),
            (p + 'g2', jnp.concatenate([lp['g2'] for lp in lps], axis=1)),
            (p + 'b2', jnp.concatenate([lp['b2'] for lp in lps], axis=1)),
        ])

    # multi-scale attention pooling (multi_attn is shared across the 3 scales)
    wA.append(('W1pool', block_diag(*([params['attn_w1']] * M))))
    bA.extend([
        ('b1pool', jnp.tile(params['attn_b1'], (1, M))),
        ('w2pool', jnp.tile(params['attn_w2'], (1, M))),
        ('b2pool', jnp.tile(params['attn_b2'], (1, HM))),
    ])

    # segment-reduce matrices (block-diag of ones) for head scores / per-token reductions
    idx = jnp.arange(HM)
    dh = H // NHEAD
    wA.append(('SEG16', (idx[:, None] // dh == idx[None, :] // dh).astype(jnp.float32)))
    wA.append(('SEG32', (idx[:, None] // H == idx[None, :] // H).astype(jnp.float32)))

    slabA, offA = _pack(wA, HM)
    slabB, offB = _pack(wB, 2 * HM)
    biasA, offBias = _pack(bA, HM)
    return dict(slabA=slabA, slabB=slabB, biasA=biasA,
                offA=offA, offB=offB, offBias=offBias)


# ------------------------------- full forward ----------------------------------
def mmahgnn_forward(packed, x, graph):
    N, N1, N2 = graph['N'], graph['N1'], graph['N2']
    # modality-independent mean of incoming edge attributes per target node (precompute once)
    agg_e0 = graph['S0_mean'] @ graph['edge_attr0']
    agg_e1 = graph['S1_mean'] @ graph['edge_attr1']
    gslab, offG = _pack([('x', x), ('A0', graph['A0_mean']), ('A1', graph['A1_mean']),
                         ('Agcn', graph['A1_gcn_mean']), ('e0', agg_e0), ('e1', agg_e1)], DIN)

    kern = functools.partial(_fused_kernel,
                             offA=packed['offA'], offB=packed['offB'],
                             offBias=packed['offBias'], offG=offG,
                             n=N, n1=N1, n2=N2)
    args = (packed['slabA'], packed['slabB'], packed['biasA'], gslab)
    return pl.pallas_call(
        kern,
        out_shape=jax.ShapeDtypeStruct((N2, HIDDEN), jnp.float32),
        in_specs=[pl.BlockSpec(a.shape, lambda: (0, 0)) for a in args],
        out_specs=pl.BlockSpec((N2, HIDDEN), lambda: (0, 0)),
    )(*args)


# ------------------------------ synthetic graph --------------------------------
def make_graph(seed=1):
    key = jax.random.PRNGKey(seed)
    N, N1, N2 = 24, 16, 8            # sampled nodes per layer (B, size0[1], size1[1])
    deg0, deg1 = 4, 4
    k0, k1, k2, k3 = jax.random.split(key, 4)
    src0 = jax.random.randint(k0, (N1, deg0), 0, N)
    src1 = jax.random.randint(k1, (N2, deg1), 0, N1)
    rows0 = jnp.arange(N1)[:, None]
    rows1 = jnp.arange(N2)[:, None]
    A0 = jnp.zeros((N1, N), jnp.float32).at[rows0, src0].add(1.0) / deg0
    A1 = jnp.zeros((N2, N1), jnp.float32).at[rows1, src1].add(1.0) / deg1
    S0 = jnp.kron(jnp.eye(N1, dtype=jnp.float32), jnp.ones((1, deg0), jnp.float32)) / deg0
    S1 = jnp.kron(jnp.eye(N2, dtype=jnp.float32), jnp.ones((1, deg1), jnp.float32)) / deg1
    edge_attr0 = jax.random.normal(k2, (N1 * deg0, EDGE_CH), jnp.float32)
    edge_attr1 = jax.random.normal(k3, (N2 * deg1, EDGE_CH), jnp.float32)
    # summary GCN graph over the N1 layer-1 nodes: layer-1 edges + self loops, mean-normalized
    Agcn = jnp.zeros((N1, N1), jnp.float32).at[rows1, src1].add(1.0) + jnp.eye(N1, dtype=jnp.float32)
    Agcn = Agcn / jnp.sum(Agcn, axis=-1, keepdims=True)
    return dict(A0_mean=A0, S0_mean=S0, edge_attr0=edge_attr0,
                A1_mean=A1, S1_mean=S1, edge_attr1=edge_attr1,
                A1_gcn_mean=Agcn, N=N, N1=N1, N2=N2)


if __name__ == "__main__":
    params = make_params(seed=0)
    packed = pack_params(params)          # one-time parameter transform (offline)
    graph = make_graph(seed=1)
    x = jax.random.normal(jax.random.PRNGKey(0),
                          (graph["N"], DIN), jnp.float32)
    out = mmahgnn_forward(packed, x, graph)
    out = jax.block_until_ready(out)
    assert out.shape == (graph["N2"], HIDDEN)
    assert bool(jnp.all(jnp.isfinite(out)))
    print("KERNEL_OK")
</pallas_src>

<mosaic_0001>
module attributes {stable_mosaic.version = 11 : i64} {
  func.func @_fused_kernel(%arg0: memref<1560x96xf32, #tpu.memory_space<vmem>>, %arg1: memref<104x192xf32, #tpu.memory_space<vmem>>, %arg2: memref<152x96xf32, #tpu.memory_space<vmem>>, %arg3: memref<88x24xf32, #tpu.memory_space<vmem>>, %arg4: memref<8x32xf32, #tpu.memory_space<vmem>>) attributes {dimension_semantics = [], scalar_prefetch = 0 : i64, scratch_operands = 0 : i64, tpu.core_type = #tpu.core_type<tc>} {
    %c0 = arith.constant 0 : index
    %c0_0 = arith.constant 0 : index
    %0 = vector.load %arg3[%c0, %c0_0] : memref<88x24xf32, #tpu.memory_space<vmem>>, vector<24x24xf32>
    %c24 = arith.constant 24 : index
    %c0_1 = arith.constant 0 : index
    %1 = vector.load %arg3[%c24, %c0_1] : memref<88x24xf32, #tpu.memory_space<vmem>>, vector<16x24xf32>
    %c40 = arith.constant 40 : index
    %c0_2 = arith.constant 0 : index
    %2 = vector.load %arg3[%c40, %c0_2] : memref<88x24xf32, #tpu.memory_space<vmem>>, vector<8x16xf32>
    %c48 = arith.constant 48 : index
    %c0_3 = arith.constant 0 : index
    %3 = vector.load %arg3[%c48, %c0_3] : memref<88x24xf32, #tpu.memory_space<vmem>>, vector<16x16xf32>
    %c64 = arith.constant 64 : index
    %c0_4 = arith.constant 0 : index
    %4 = vector.load %arg3[%c64, %c0_4] : memref<88x24xf32, #tpu.memory_space<vmem>>, vector<16x8xf32>
    %c80 = arith.constant 80 : index
    %c0_5 = arith.constant 0 : index
    %5 = vector.load %arg3[%c80, %c0_5] : memref<88x24xf32, #tpu.memory_space<vmem>>, vector<8x8xf32>
    %c1368 = arith.constant 1368 : index
    %c0_6 = arith.constant 0 : index
    %6 = vector.load %arg0[%c1368, %c0_6] : memref<1560x96xf32, #tpu.memory_space<vmem>>, vector<96x96xf32>
    %c1464 = arith.constant 1464 : index
    %c0_7 = arith.constant 0 : index
    %7 = vector.load %arg0[%c1464, %c0_7] : memref<1560x96xf32, #tpu.memory_space<vmem>>, vector<96x96xf32>
    %8 = vector.extract_strided_slice %0 {offsets = [0, 0], sizes = [16, 24], strides = [1, 1]} : vector<24x24xf32> to vector<16x24xf32>
    %c0_8 = arith.constant 0 : index
    %c0_9 = arith.constant 0 : index
    %9 = vector.load %arg0[%c0_8, %c0_9] : memref<1560x96xf32, #tpu.memory_space<vmem>>, vector<24x96xf32>
    %cst = arith.constant dense<0.000000e+00> : vector<24x96xf32>
    %10 = tpu.matmul %0, %9, %cst {dimension_numbers = #tpu.dot_dimension_numbers<[1], [0], [0], [1], [0, 0, 1, 1], [], []>} : vector<24x24xf32>, vector<24x96xf32>, vector<24x96xf32> -> vector<24x96xf32>
    %c0_10 = arith.constant 0 : index
    %c0_11 = arith.constant 0 : index
    %11 = vector.load %arg2[%c0_10, %c0_11] : memref<152x96xf32, #tpu.memory_space<vmem>>, vector<1x96xf32>
    %12 = vector.broadcast %11 : vector<1x96xf32> to vector<24x96xf32>
    %13 = arith.addf %10, %12 : vector<24x96xf32>
    %cst_12 = arith.constant dense<0.000000e+00> : vector<16x96xf32>
    %14 = tpu.matmul %1, %13, %cst_12 {dimension_numbers = #tpu.dot_dimension_numbers<[1], [0], [0], [1], [0, 0, 1, 1], [], []>} : vector<16x24xf32>, vector<24x96xf32>, vector<16x96xf32> -> vector<16x96xf32>
    %c24_13 = arith.constant 24 : index
    %c0_14 = arith.constant 0 : index
    %15 = vector.load %arg0[%c24_13, %c0_14] : memref<1560x96xf32, #tpu.memory_space<vmem>>, vector<96x96xf32>
    %cst_15 = arith.constant dense<0.000000e+00> : vector<16x96xf32>
    %16 = tpu.matmul %14, %15, %cst_15 {dimension_numbers = #tpu.dot_dimension_numbers<[1], [0], [0], [1], [0, 0, 1, 1], [], []>} : vector<16x96xf32>, vector<96x96xf32>, vector<16x96xf32> -> vector<16x96xf32>
    %c120 = arith.constant 120 : index
    %c0_16 = arith.constant 0 : index
    %17 = vector.load %arg0[%c120, %c0_16] : memref<1560x96xf32, #tpu.memory_space<vmem>>, vector<8x96xf32>
    %cst_17 = arith.constant dense<0.000000e+00> : vector<16x96xf32>
    %18 = tpu.matmul %4, %17, %cst_17 {dimension_numbers = #tpu.dot_dimension_numbers<[1], [0], [0], [1], [0, 0, 1, 1], [], []>} : vector<16x8xf32>, vector<8x96xf32>, vector<16x96xf32> -> vector<16x96xf32>
    %19 = arith.addf %16, %18 : vector<16x96xf32>
    %c128 = arith.constant 128 : index
    %c0_18 = arith.constant 0 : index
    %20 = vector.load %arg0[%c128, %c0_18] : memref<1560x96xf32, #tpu.memory_space<vmem>>, vector<24x96xf32>
    %cst_19 = arith.constant dense<0.000000e+00> : vector<16x96xf32>
    %21 = tpu.matmul %8, %20, %cst_19 {dimension_numbers = #tpu.dot_dimension_numbers<[1], [0], [0], [1], [0, 0, 1, 1], [], []>} : vector<16x24xf32>, vector<24x96xf32>, vector<16x96xf32> -> vector<16x96xf32>
    %22 = arith.addf %19, %21 : vector<16x96xf32>
    %c8 = arith.constant 8 : index
    %c0_20 = arith.constant 0 : index
    %23 = vector.load %arg2[%c8, %c0_20] : memref<152x96xf32, #tpu.memory_space<vmem>>, vector<1x96xf32>
    %24 = vector.broadcast %23 : vector<1x96xf32> to vector<16x96xf32>
    %25 = arith.addf %22, %24 : vector<16x96xf32>
    %26 = arith.mulf %25, %25 : vector<16x96xf32>
    %cst_21 = arith.constant dense<0.000000e+00> : vector<16x96xf32>
    %27 = tpu.matmul %26, %7, %cst_21 {dimension_numbers = #tpu.dot_dimension_numbers<[1], [0], [0], [1], [0, 0, 1, 1], [], []>} : vector<16x96xf32>, vector<96x96xf32>, vector<16x96xf32> -> vector<16x96xf32>
    %cst_22 = arith.constant 1.000000e-24 : f32
    %28 = vector.broadcast %cst_22 : f32 to vector<16x96xf32>
    %29 = arith.maximumf %27, %28 : vector<16x96xf32>
    %30 = math.rsqrt %29 : vector<16x96xf32>
    %31 = arith.mulf %25, %30 : vector<16x96xf32>
    %cst_23 = arith.constant 0.000000e+00 : f32
    %32 = vector.broadcast %cst_23 : f32 to vector<16x96xf32>
    %33 = arith.maximumf %31, %32 : vector<16x96xf32>
    %cst_24 = arith.constant dense<0.000000e+00> : vector<16x96xf32>
    %34 = tpu.matmul %3, %33, %cst_24 {dimension_numbers = #tpu.dot_dimension_numbers<[1], [0], [0], [1], [0, 0, 1, 1], [], []>} : vector<16x16xf32>, vector<16x96xf32>, vector<16x96xf32> -> vector<16x96xf32>
    %c600 = arith.constant 600 : index
    %c0_25 = arith.constant 0 : index
    %35 = vector.load %arg0[%c600, %c0_25] : memref<1560x96xf32, #tpu.memory_space<vmem>>, vector<96x96xf32>
    %cst_26 = arith.constant dense<0.000000e+00> : vector<16x96xf32>
    %36 = tpu.matmul %34, %35, %cst_26 {dimension_numbers = #tpu.dot_dimension_numbers<[1], [0], [0], [1], [0, 0, 1, 1], [], []>} : vector<16x96xf32>, vector<96x96xf32>, vector<16x96xf32> -> vector<16x96xf32>
    %c48_27 = arith.constant 48 : index
    %c0_28 = arith.constant 0 : index
    %37 = vector.load %arg2[%c48_27, %c0_28] : memref<152x96xf32, #tpu.memory_space<vmem>>, vector<1x96xf32>
    %38 = vector.broadcast %37 : vector<1x96xf32> to vector<16x96xf32>
    %39 = arith.addf %36, %38 : vector<16x96xf32>
    %40 = vector.extract_strided_slice %33 {offsets = [0, 0], sizes = [8, 96], strides = [1, 1]} : vector<16x96xf32> to vector<8x96xf32>
    %c152 = arith.constant 152 : index
    %c0_29 = arith.constant 0 : index
    %41 = vector.load %arg0[%c152, %c0_29] : memref<1560x96xf32, #tpu.memory_space<vmem>>, vector<96x96xf32>
    %cst_30 = arith.constant dense<0.000000e+00> : vector<16x96xf32>
    %42 = tpu.matmul %33, %41, %cst_30 {dimension_numbers = #tpu.dot_dimension_numbers<[1], [0], [0], [1], [0, 0, 1, 1], [], []>} : vector<16x96xf32>, vector<96x96xf32>, vector<16x96xf32> -> vector<16x96xf32>
    %c16 = arith.constant 16 : index
    %c0_31 = arith.constant 0 : index
    %43 = vector.load %arg2[%c16, %c0_31] : memref<152x96xf32, #tpu.memory_space<vmem>>, vector<1x96xf32>
    %44 = vector.broadcast %43 : vector<1x96xf32> to vector<16x96xf32>
    %45 = arith.addf %42, %44 : vector<16x96xf32>
    %cst_32 = arith.constant dense<0.000000e+00> : vector<8x96xf32>
    %46 = tpu.matmul %2, %45, %cst_32 {dimension_numbers = #tpu.dot_dimension_numbers<[1], [0], [0], [1], [0, 0, 1, 1], [], []>} : vector<8x16xf32>, vector<16x96xf32>, vector<8x96xf32> -> vector<8x96xf32>
    %c248 = arith.constant 248 : index
    %c0_33 = arith.constant 0 : index
    %47 = vector.load %arg0[%c248, %c0_33] : memref<1560x96xf32, #tpu.memory_space<vmem>>, vector<96x96xf32>
    %cst_34 = arith.constant dense<0.000000e+00> : vector<8x96xf32>
    %48 = tpu.matmul %46, %47, %cst_34 {dimension_numbers = #tpu.dot_dimension_numbers<[1], [0], [0], [1], [0, 0, 1, 1], [], []>} : vector<8x96xf32>, vector<96x96xf32>, vector<8x96xf32> -> vector<8x96xf32>
    %c344 = arith.constant 344 : index
    %c0_35 = arith.constant 0 : index
    %49 = vector.load %arg0[%c344, %c0_35] : memref<1560x96xf32, #tpu.memory_space<vmem>>, vector<8x96xf32>
    %cst_36 = arith.constant dense<0.000000e+00> : vector<8x96xf32>
    %50 = tpu.matmul %5, %49, %cst_36 {dimension_numbers = #tpu.dot_dimension_numbers<[1], [0], [0], [1], [0, 0, 1, 1], [], []>} : vector<8x8xf32>, vector<8x96xf32>, vector<8x96xf32> -> vector<8x96xf32>
    %51 = arith.addf %48, %50 : vector<8x96xf32>
    %c352 = arith.constant 352 : index
    %c0_37 = arith.constant 0 : index
    %52 = vector.load %arg0[%c352, %c0_37] : memref<1560x96xf32, #tpu.memory_space<vmem>>, vector<96x96xf32>
    %cst_38 = arith.constant dense<0.000000e+00> : vector<8x96xf32>
    %53 = tpu.matmul %40, %52, %cst_38 {dimension_numbers = #tpu.dot_dimension_numbers<[1], [0], [0], [1], [0, 0, 1, 1], [], []>} : vector<8x96xf32>, vector<96x96xf32>, vector<8x96xf32> -> vector<8x96xf32>
    %54 = arith.addf %51, %53 : vector<8x96xf32>
    %c24_39 = arith.constant 24 : index
    %c0_40 = arith.constant 0 : index
    %55 = vector.load %arg2[%c24_39, %c0_40] : memref<152x96xf32, #tpu.memory_space<vmem>>, vector<1x96xf32>
    %56 = vector.broadcast %55 : vector<1x96xf32> to vector<8x96xf32>
    %57 = arith.addf %54, %56 : vector<8x96xf32>
    %58 = arith.mulf %57, %57 : vector<8x96xf32>
    %cst_41 = arith.constant dense<0.000000e+00> : vector<8x96xf32>
    %59 = tpu.matmul %58, %7, %cst_41 {dimension_numbers = #tpu.dot_dimension_numbers<[1], [0], [0], [1], [0, 0, 1, 1], [], []>} : vector<8x96xf32>, vector<96x96xf32>, vector<8x96xf32> -> vector<8x96xf32>
    %cst_42 = arith.constant 1.000000e-24 : f32
    %60 = vector.broadcast %cst_42 : f32 to vector<8x96xf32>
    %61 = arith.maximumf %59, %60 : vector<8x96xf32>
    %62 = math.rsqrt %61 : vector<8x96xf32>
    %63 = arith.mulf %57, %62 : vector<8x96xf32>
    %64 = vector.extract_strided_slice %0 {offsets = [0, 0], sizes = [16, 24], strides = [1, 1]} : vector<24x24xf32> to vector<16x24xf32>
    %65 = vector.extract_strided_slice %0 {offsets = [0, 0], sizes = [8, 24], strides = [1, 1]} : vector<24x24xf32> to vector<8x24xf32>
    %c448 = arith.constant 448 : index
    %c0_43 = arith.constant 0 : index
    %66 = vector.load %arg0[%c448, %c0_43] : memref<1560x96xf32, #tpu.memory_space<vmem>>, vector<24x96xf32>
    %cst_44 = arith.constant dense<0.000000e+00> : vector<16x96xf32>
    %67 = tpu.matmul %64, %66, %cst_44 {dimension_numbers = #tpu.dot_dimension_numbers<[1], [0], [0], [1], [0, 0, 1, 1], [], []>} : vector<16x24xf32>, vector<24x96xf32>, vector<16x96xf32> -> vector<16x96xf32>
    %c32 = arith.constant 32 : index
    %c0_45 = arith.constant 0 : index
    %68 = vector.load %arg2[%c32, %c0_45] : memref<152x96xf32, #tpu.memory_space<vmem>>, vector<1x96xf32>
    %69 = vector.broadcast %68 : vector<1x96xf32> to vector<16x96xf32>
    %70 = arith.addf %67, %69 : vector<16x96xf32>
    %cst_46 = arith.constant dense<0.000000e+00> : vector<8x96xf32>
    %71 = tpu.matmul %2, %70, %cst_46 {dimension_numbers = #tpu.dot_dimension_numbers<[1], [0], [0], [1], [0, 0, 1, 1], [], []>} : vector<8x16xf32>, vector<16x96xf32>, vector<8x96xf32> -> vector<8x96xf32>
    %c472 = arith.constant 472 : index
    %c0_47 = arith.constant 0 : index
    %72 = vector.load %arg0[%c472, %c0_47] : memref<1560x96xf32, #tpu.memory_space<vmem>>, vector<96x96xf32>
    %cst_48 = arith.constant dense<0.000000e+00> : vector<8x96xf32>
    %73 = tpu.matmul %71, %72, %cst_48 {dimension_numbers = #tpu.dot_dimension_numbers<[1], [0], [0], [1], [0, 0, 1, 1], [], []>} : vector<8x96xf32>, vector<96x96xf32>, vector<8x96xf32> -> vector<8x96xf32>
    %c568 = arith.constant 568 : index
    %c0_49 = arith.constant 0 : index
    %74 = vector.load %arg0[%c568, %c0_49] : memref<1560x96xf32, #tpu.memory_space<vmem>>, vector<8x96xf32>
    %cst_50 = arith.constant dense<0.000000e+00> : vector<8x96xf32>
    %75 = tpu.matmul %5, %74, %cst_50 {dimension_numbers = #tpu.dot_dimension_numbers<[1], [0], [0], [1], [0, 0, 1, 1], [], []>} : vector<8x8xf32>, vector<8x96xf32>, vector<8x96xf32> -> vector<8x96xf32>
    %76 = arith.addf %73, %75 : vector<8x96xf32>
    %c576 = arith.constant 576 : index
    %c0_51 = arith.constant 0 : index
    %77 = vector.load %arg0[%c576, %c0_51] : memref<1560x96xf32, #tpu.memory_space<vmem>>, vector<24x96xf32>
    %cst_52 = arith.constant dense<0.000000e+00> : vector<8x96xf32>
    %78 = tpu.matmul %65, %77, %cst_52 {dimension_numbers = #tpu.dot_dimension_numbers<[1], [0], [0], [1], [0, 0, 1, 1], [], []>} : vector<8x24xf32>, vector<24x96xf32>, vector<8x96xf32> -> vector<8x96xf32>
    %79 = arith.addf %76, %78 : vector<8x96xf32>
    %c40_53 = arith.constant 40 : index
    %c0_54 = arith.constant 0 : index
    %80 = vector.load %arg2[%c40_53, %c0_54] : memref<152x96xf32, #tpu.memory_space<vmem>>, vector<1x96xf32>
    %81 = vector.broadcast %80 : vector<1x96xf32> to vector<8x96xf32>
    %82 = arith.addf %79, %81 : vector<8x96xf32>
    %83 = arith.mulf %82, %82 : vector<8x96xf32>
    %cst_55 = arith.constant dense<0.000000e+00> : vector<8x96xf32>
    %84 = tpu.matmul %83, %7, %cst_55 {dimension_numbers = #tpu.dot_dimension_numbers<[1], [0], [0], [1], [0, 0, 1, 1], [], []>} : vector<8x96xf32>, vector<96x96xf32>, vector<8x96xf32> -> vector<8x96xf32>
    %cst_56 = arith.constant 1.000000e-24 : f32
    %85 = vector.broadcast %cst_56 : f32 to vector<8x96xf32>
    %86 = arith.maximumf %84, %85 : vector<8x96xf32>
    %87 = math.rsqrt %86 : vector<8x96xf32>
    %88 = arith.mulf %82, %87 : vector<8x96xf32>
    %89 = vector.extract_strided_slice %39 {offsets = [0, 0], sizes = [8, 96], strides = [1, 1]} : vector<16x96xf32> to vector<8x96xf32>
    %90 = vector.extract_strided_slice %88 {offsets = [0, 0], sizes = [8, 32], strides = [1, 1]} : vector<8x96xf32> to vector<8x32xf32>
    %91 = vector.extract_strided_slice %88 {offsets = [0, 32], sizes = [8, 32], strides = [1, 1]} : vector<8x96xf32> to vector<8x32xf32>
    %92 = vector.extract_strided_slice %88 {offsets = [0, 64], sizes = [8, 32], strides = [1, 1]} : vector<8x96xf32> to vector<8x32xf32>
    %93 = tpu.concatenate %90, %91, %92 in 0 : vector<8x32xf32>, vector<8x32xf32>, vector<8x32xf32> -> vector<24x32xf32>
    %94 = vector.extract_strided_slice %63 {offsets = [0, 0], sizes = [8, 32], strides = [1, 1]} : vector<8x96xf32> to vector<8x32xf32>
    %95 = vector.extract_strided_slice %63 {offsets = [0, 32], sizes = [8, 32], strides = [1, 1]} : vector<8x96xf32> to vector<8x32xf32>
    %96 = vector.extract_strided_slice %63 {offsets = [0, 64], sizes = [8, 32], strides = [1, 1]} : vector<8x96xf32> to vector<8x32xf32>
    %97 = tpu.concatenate %94, %95, %96 in 0 : vector<8x32xf32>, vector<8x32xf32>, vector<8x32xf32> -> vector<24x32xf32>
    %98 = vector.extract_strided_slice %89 {offsets = [0, 0], sizes = [8, 32], strides = [1, 1]} : vector<8x96xf32> to vector<8x32xf32>
    %99 = vector.extract_strided_slice %89 {offsets = [0, 32], sizes = [8, 32], strides = [1, 1]} : vector<8x96xf32> to vector<8x32xf32>
    %100 = vector.extract_strided_slice %89 {offsets = [0, 64], sizes = [8, 32], strides = [1, 1]} : vector<8x96xf32> to vector<8x32xf32>
    %101 = tpu.concatenate %98, %99, %100 in 0 : vector<8x32xf32>, vector<8x32xf32>, vector<8x32xf32> -> vector<24x32xf32>
    %102 = tpu.concatenate %93, %97, %101 in 1 : vector<24x32xf32>, vector<24x32xf32>, vector<24x32xf32> -> vector<24x96xf32>
    %c696 = arith.constant 696 : index
    %c0_57 = arith.constant 0 : index
    %103 = vector.load %arg0[%c696, %c0_57] : memref<1560x96xf32, #tpu.memory_space<vmem>>, vector<96x96xf32>
    %cst_58 = arith.constant dense<0.000000e+00> : vector<24x96xf32>
    %104 = tpu.matmul %102, %103, %cst_58 {dimension_numbers = #tpu.dot_dimension_numbers<[1], [0], [0], [1], [0, 0, 1, 1], [], []>} : vector<24x96xf32>, vector<96x96xf32>, vector<24x96xf32> -> vector<24x96xf32>
    %c56 = arith.constant 56 : index
    %c0_59 = arith.constant 0 : index
    %105 = vector.load %arg2[%c56, %c0_59] : memref<152x96xf32, #tpu.memory_space<vmem>>, vector<1x96xf32>
    %106 = vector.broadcast %105 : vector<1x96xf32> to vector<24x96xf32>
    %107 = arith.addf %104, %106 : vector<24x96xf32>
    %c792 = arith.constant 792 : index
    %c0_60 = arith.constant 0 : index
    %108 = vector.load %arg0[%c792, %c0_60] : memref<1560x96xf32, #tpu.memory_space<vmem>>, vector<96x96xf32>
    %cst_61 = arith.constant dense<0.000000e+00> : vector<24x96xf32>
    %109 = tpu.matmul %102, %108, %cst_61 {dimension_numbers = #tpu.dot_dimension_numbers<[1], [0], [0], [1], [0, 0, 1, 1], [], []>} : vector<24x96xf32>, vector<96x96xf32>, vector<24x96xf32> -> vector<24x96xf32>
    %c64_62 = arith.constant 64 : index
    %c0_63 = arith.constant 0 : index
    %110 = vector.load %arg2[%c64_62, %c0_63] : memref<152x96xf32, #tpu.memory_space<vmem>>, vector<1x96xf32>
    %111 = vector.broadcast %110 : vector<1x96xf32> to vector<24x96xf32>
    %112 = arith.addf %109, %111 : vector<24x96xf32>
    %c888 = arith.constant 888 : index
    %c0_64 = arith.constant 0 : index
    %113 = vector.load %arg0[%c888, %c0_64] : memref<1560x96xf32, #tpu.memory_space<vmem>>, vector<96x96xf32>
    %cst_65 = arith.constant dense<0.000000e+00> : vector<24x96xf32>
    %114 = tpu.matmul %102, %113, %cst_65 {dimension_numbers = #tpu.dot_dimension_numbers<[1], [0], [0], [1], [0, 0, 1, 1], [], []>} : vector<24x96xf32>, vector<96x96xf32>, vector<24x96xf32> -> vector<24x96xf32>
    %c72 = arith.constant 72 : index
    %c0_66 = arith.constant 0 : index
    %115 = vector.load %arg2[%c72, %c0_66] : memref<152x96xf32, #tpu.memory_space<vmem>>, vector<1x96xf32>
    %116 = vector.broadcast %115 : vector<1x96xf32> to vector<24x96xf32>
    %117 = arith.addf %114, %116 : vector<24x96xf32>
    %118 = vector.extract_strided_slice %112 {offsets = [0, 0], sizes = [8, 96], strides = [1, 1]} : vector<24x96xf32> to vector<8x96xf32>
    %119 = vector.extract_strided_slice %117 {offsets = [0, 0], sizes = [8, 96], strides = [1, 1]} : vector<24x96xf32> to vector<8x96xf32>
    %120 = tpu.concatenate %118, %118, %118 in 0 : vector<8x96xf32>, vector<8x96xf32>, vector<8x96xf32> -> vector<24x96xf32>
    %121 = tpu.concatenate %119, %119, %119 in 0 : vector<8x96xf32>, vector<8x96xf32>, vector<8x96xf32> -> vector<24x96xf32>
    %122 = arith.mulf %107, %120 : vector<24x96xf32>
    %cst_67 = arith.constant dense<0.000000e+00> : vector<24x96xf32>
    %123 = tpu.matmul %122, %6, %cst_67 {dimension_numbers = #tpu.dot_dimension_numbers<[1], [0], [0], [1], [0, 0, 1, 1], [], []>} : vector<24x96xf32>, vector<96x96xf32>, vector<24x96xf32> -> vector<24x96xf32>
    %124 = vector.extract_strided_slice %112 {offsets = [8, 0], sizes = [8, 96], strides = [1, 1]} : vector<24x96xf32> to vector<8x96xf32>
    %125 = vector.extract_strided_slice %117 {offsets = [8, 0], sizes = [8, 96], strides = [1, 1]} : vector<24x96xf32> to vector<8x96xf32>
    %126 = tpu.concatenate %124, %124, %124 in 0 : vector<8x96xf32>, vector<8x96xf32>, vector<8x96xf32> -> vector<24x96xf32>
    %127 = tpu.concatenate %125, %125, %125 in 0 : vector<8x96xf32>, vector<8x96xf32>, vector<8x96xf32> -> vector<24x96xf32>
    %128 = arith.mulf %107, %126 : vector<24x96xf32>
    %cst_68 = arith.constant dense<0.000000e+00> : vector<24x96xf32>
    %129 = tpu.matmul %128, %6, %cst_68 {dimension_numbers = #tpu.dot_dimension_numbers<[1], [0], [0], [1], [0, 0, 1, 1], [], []>} : vector<24x96xf32>, vector<96x96xf32>, vector<24x96xf32> -> vector<24x96xf32>
    %130 = vector.extract_strided_slice %112 {offsets = [16, 0], sizes = [8, 96], strides = [1, 1]} : vector<24x96xf32> to vector<8x96xf32>
    %131 = vector.extract_strided_slice %117 {offsets = [16, 0], sizes = [8, 96], strides = [1, 1]} : vector<24x96xf32> to vector<8x96xf32>
    %132 = tpu.concatenate %130, %130, %130 in 0 : vector<8x96xf32>, vector<8x96xf32>, vector<8x96xf32> -> vector<24x96xf32>
    %133 = tpu.concatenate %131, %131, %131 in 0 : vector<8x96xf32>, vector<8x96xf32>, vector<8x96xf32> -> vector<24x96xf32>
    %134 = arith.mulf %107, %132 : vector<24x96xf32>
    %cst_69 = arith.constant dense<0.000000e+00> : vector<24x96xf32>
    %135 = tpu.matmul %134, %6, %cst_69 {dimension_numbers = #tpu.dot_dimension_numbers<[1], [0], [0], [1], [0, 0, 1, 1], [], []>} : vector<24x96xf32>, vector<96x96xf32>, vector<24x96xf32> -> vector<24x96xf32>
    %136 = arith.maximumf %123, %129 : vector<24x96xf32>
    %137 = arith.maximumf %136, %135 : vector<24x96xf32>
    %138 = arith.subf %123, %137 : vector<24x96xf32>
    %139 = math.exp %138 : vector<24x96xf32>
    %140 = arith.subf %129, %137 : vector<24x96xf32>
    %141 = math.exp %140 : vector<24x96xf32>
    %142 = arith.subf %135, %137 : vector<24x96xf32>
    %143 = math.exp %142 : vector<24x96xf32>
    %144 = arith.addf %139, %141 : vector<24x96xf32>
    %145 = arith.addf %144, %143 : vector<24x96xf32>
    %cst_70 = arith.constant 1.000000e+00 : f32
    %146 = vector.broadcast %cst_70 : f32 to vector<24x96xf32>
    %147 = arith.divf %146, %145 : vector<24x96xf32>
    %148 = arith.mulf %139, %147 : vector<24x96xf32>
    %149 = arith.mulf %148, %121 : vector<24x96xf32>
    %150 = arith.mulf %141, %147 : vector<24x96xf32>
    %151 = arith.mulf %150, %127 : vector<24x96xf32>
    %152 = arith.addf %149, %151 : vector<24x96xf32>
    %153 = arith.mulf %143, %147 : vector<24x96xf32>
    %154 = arith.mulf %153, %133 : vector<24x96xf32>
    %155 = arith.addf %152, %154 : vector<24x96xf32>
    %c984 = arith.constant 984 : index
    %c0_71 = arith.constant 0 : index
    %156 = vector.load %arg0[%c984, %c0_71] : memref<1560x96xf32, #tpu.memory_space<vmem>>, vector<96x96xf32>
    %cst_72 = arith.constant dense<0.000000e+00> : vector<24x96xf32>
    %157 = tpu.matmul %155, %156, %cst_72 {dimension_numbers = #tpu.dot_dimension_numbers<[1], [0], [0], [1], [0, 0, 1, 1], [], []>} : vector<24x96xf32>, vector<96x96xf32>, vector<24x96xf32> -> vector<24x96xf32>
    %c80_73 = arith.constant 80 : index
    %c0_74 = arith.constant 0 : index
    %158 = vector.load %arg2[%c80_73, %c0_74] : memref<152x96xf32, #tpu.memory_space<vmem>>, vector<1x96xf32>
    %159 = vector.broadcast %158 : vector<1x96xf32> to vector<24x96xf32>
    %160 = arith.addf %157, %159 : vector<24x96xf32>
    %161 = arith.addf %102, %160 : vector<24x96xf32>
    %c88 = arith.constant 88 : index
    %c0_75 = arith.constant 0 : index
    %162 = vector.load %arg2[%c88, %c0_75] : memref<152x96xf32, #tpu.memory_space<vmem>>, vector<1x96xf32>
    %c96 = arith.constant 96 : index
    %c0_76 = arith.constant 0 : index
    %163 = vector.load %arg2[%c96, %c0_76] : memref<152x96xf32, #tpu.memory_space<vmem>>, vector<1x96xf32>
    %cst_77 = arith.constant dense<0.000000e+00> : vector<24x96xf32>
    %164 = tpu.matmul %161, %7, %cst_77 {dimension_numbers = #tpu.dot_dimension_numbers<[1], [0], [0], [1], [0, 0, 1, 1], [], []>} : vector<24x96xf32>, vector<96x96xf32>, vector<24x96xf32> -> vector<24x96xf32>
    %cst_78 = arith.constant 3.125000e-02 : f32
    %165 = vector.broadcast %cst_78 : f32 to vector<24x96xf32>
    %166 = arith.mulf %164, %165 : vector<24x96xf32>
    %167 = arith.subf %161, %166 : vector<24x96xf32>
    %168 = arith.mulf %167, %167 : vector<24x96xf32>
    %cst_79 = arith.constant dense<0.000000e+00> : vector<24x96xf32>
    %169 = tpu.matmul %168, %7, %cst_79 {dimension_numbers = #tpu.dot_dimension_numbers<[1], [0], [0], [1], [0, 0, 1, 1], [], []>} : vector<24x96xf32>, vector<96x96xf32>, vector<24x96xf32> -> vector<24x96xf32>
    %cst_80 = arith.constant 3.125000e-02 : f32
    %170 = vector.broadcast %cst_80 : f32 to vector<24x96xf32>
    %171 = arith.mulf %169, %170 : vector<24x96xf32>
    %cst_81 = arith.constant 9.99999974E-6 : f32
    %172 = vector.broadcast %cst_81 : f32 to vector<24x96xf32>
    %173 = arith.addf %171, %172 : vector<24x96xf32>
    %174 = math.rsqrt %173 : vector<24x96xf32>
    %175 = arith.mulf %167, %174 : vector<24x96xf32>
    %176 = vector.broadcast %162 : vector<1x96xf32> to vector<24x96xf32>
    %177 = arith.mulf %175, %176 : vector<24x96xf32>
    %178 = vector.broadcast %163 : vector<1x96xf32> to vector<24x96xf32>
    %179 = arith.addf %177, %178 : vector<24x96xf32>
    %c0_82 = arith.constant 0 : index
    %c0_83 = arith.constant 0 : index
    %180 = vector.load %arg1[%c0_82, %c0_83] : memref<104x192xf32, #tpu.memory_space<vmem>>, vector<96x192xf32>
    %cst_84 = arith.constant dense<0.000000e+00> : vector<24x192xf32>
    %181 = tpu.matmul %179, %180, %cst_84 {dimension_numbers = #tpu.dot_dimension_numbers<[1], [0], [0], [1], [0, 0, 1, 1], [], []>} : vector<24x96xf32>, vector<96x192xf32>, vector<24x192xf32> -> vector<24x192xf32>
    %c96_85 = arith.constant 96 : index
    %c0_86 = arith.constant 0 : index
    %182 = vector.load %arg1[%c96_85, %c0_86] : memref<104x192xf32, #tpu.memory_space<vmem>>, vector<1x192xf32>
    %183 = vector.broadcast %182 : vector<1x192xf32> to vector<24x192xf32>
    %184 = arith.addf %181, %183 : vector<24x192xf32>
    %cst_87 = arith.constant 0.000000e+00 : f32
    %185 = vector.broadcast %cst_87 : f32 to vector<24x192xf32>
    %186 = arith.maximumf %184, %185 : vector<24x192xf32>
    %c1080 = arith.constant 1080 : index
    %c0_88 = arith.constant 0 : index
    %187 = vector.load %arg0[%c1080, %c0_88] : memref<1560x96xf32, #tpu.memory_space<vmem>>, vector<192x96xf32>
    %cst_89 = arith.constant dense<0.000000e+00> : vector<24x96xf32>
    %188 = tpu.matmul %186, %187, %cst_89 {dimension_numbers = #tpu.dot_dimension_numbers<[1], [0], [0], [1], [0, 0, 1, 1], [], []>} : vector<24x192xf32>, vector<192x96xf32>, vector<24x96xf32> -> vector<24x96xf32>
    %c104 = arith.constant 104 : index
    %c0_90 = arith.constant 0 : index
    %189 = vector.load %arg2[%c104, %c0_90] : memref<152x96xf32, #tpu.memory_space<vmem>>, vector<1x96xf32>
    %190 = vector.broadcast %189 : vector<1x96xf32> to vector<24x96xf32>
    %191 = arith.addf %188, %190 : vector<24x96xf32>
    %192 = arith.addf %179, %191 : vector<24x96xf32>
    %c112 = arith.constant 112 : index
    %c0_91 = arith.constant 0 : index
    %193 = vector.load %arg2[%c112, %c0_91] : memref<152x96xf32, #tpu.memory_space<vmem>>, vector<1x96xf32>
    %c120_92 = arith.constant 120 : index
    %c0_93 = arith.constant 0 : index
    %194 = vector.load %arg2[%c120_92, %c0_93] : memref<152x96xf32, #tpu.memory_space<vmem>>, vector<1x96xf32>
    %cst_94 = arith.constant dense<0.000000e+00> : vector<24x96xf32>
    %195 = tpu.matmul %192, %7, %cst_94 {dimension_numbers = #tpu.dot_dimension_numbers<[1], [0], [0], [1], [0, 0, 1, 1], [], []>} : vector<24x96xf32>, vector<96x96xf32>, vector<24x96xf32> -> vector<24x96xf32>
    %cst_95 = arith.constant 3.125000e-02 : f32
    %196 = vector.broadcast %cst_95 : f32 to vector<24x96xf32>
    %197 = arith.mulf %195, %196 : vector<24x96xf32>
    %198 = arith.subf %192, %197 : vector<24x96xf32>
    %199 = arith.mulf %198, %198 : vector<24x96xf32>
    %cst_96 = arith.constant dense<0.000000e+00> : vector<24x96xf32>
    %200 = tpu.matmul %199, %7, %cst_96 {dimension_numbers = #tpu.dot_dimension_numbers<[1], [0], [0], [1], [0, 0, 1, 1], [], []>} : vector<24x96xf32>, vector<96x96xf32>, vector<24x96xf32> -> vector<24x96xf32>
    %cst_97 = arith.constant 3.125000e-02 : f32
    %201 = vector.broadcast %cst_97 : f32 to vector<24x96xf32>
    %202 = arith.mulf %200, %201 : vector<24x96xf32>
    %cst_98 = arith.constant 9.99999974E-6 : f32
    %203 = vector.broadcast %cst_98 : f32 to vector<24x96xf32>
    %204 = arith.addf %202, %203 : vector<24x96xf32>
    %205 = math.rsqrt %204 : vector<24x96xf32>
    %206 = arith.mulf %198, %205 : vector<24x96xf32>
    %207 = vector.broadcast %193 : vector<1x96xf32> to vector<24x96xf32>
    %208 = arith.mulf %206, %207 : vector<24x96xf32>
    %209 = vector.broadcast %194 : vector<1x96xf32> to vector<24x96xf32>
    %210 = arith.addf %208, %209 : vector<24x96xf32>
    %211 = vector.extract_strided_slice %210 {offsets = [0, 0], sizes = [8, 96], strides = [1, 1]} : vector<24x96xf32> to vector<8x96xf32>
    %212 = vector.extract_strided_slice %210 {offsets = [8, 0], sizes = [8, 96], strides = [1, 1]} : vector<24x96xf32> to vector<8x96xf32>
    %213 = arith.addf %211, %212 : vector<8x96xf32>
    %214 = vector.extract_strided_slice %210 {offsets = [16, 0], sizes = [8, 96], strides = [1, 1]} : vector<24x96xf32> to vector<8x96xf32>
    %215 = arith.addf %213, %214 : vector<8x96xf32>
    %cst_99 = arith.constant 0.333333343 : f32
    %216 = vector.broadcast %cst_99 : f32 to vector<8x96xf32>
    %217 = arith.mulf %215, %216 : vector<8x96xf32>
    %c1272 = arith.constant 1272 : index
    %c0_100 = arith.constant 0 : index
    %218 = vector.load %arg0[%c1272, %c0_100] : memref<1560x96xf32, #tpu.memory_space<vmem>>, vector<96x96xf32>
    %cst_101 = arith.constant dense<0.000000e+00> : vector<8x96xf32>
    %219 = tpu.matmul %217, %218, %cst_101 {dimension_numbers = #tpu.dot_dimension_numbers<[1], [0], [0], [1], [0, 0, 1, 1], [], []>} : vector<8x96xf32>, vector<96x96xf32>, vector<8x96xf32> -> vector<8x96xf32>
    %c128_102 = arith.constant 128 : index
    %c0_103 = arith.constant 0 : index
    %220 = vector.load %arg2[%c128_102, %c0_103] : memref<152x96xf32, #tpu.memory_space<vmem>>, vector<1x96xf32>
    %221 = vector.broadcast %220 : vector<1x96xf32> to vector<8x96xf32>
    %222 = arith.addf %219, %221 : vector<8x96xf32>
    %223 = math.tanh %222 : vector<8x96xf32>
    %c136 = arith.constant 136 : index
    %c0_104 = arith.constant 0 : index
    %224 = vector.load %arg2[%c136, %c0_104] : memref<152x96xf32, #tpu.memory_space<vmem>>, vector<1x96xf32>
    %225 = vector.broadcast %224 : vector<1x96xf32> to vector<8x96xf32>
    %226 = arith.mulf %223, %225 : vector<8x96xf32>
    %cst_105 = arith.constant dense<0.000000e+00> : vector<8x96xf32>
    %227 = tpu.matmul %226, %7, %cst_105 {dimension_numbers = #tpu.dot_dimension_numbers<[1], [0], [0], [1], [0, 0, 1, 1], [], []>} : vector<8x96xf32>, vector<96x96xf32>, vector<8x96xf32> -> vector<8x96xf32>
    %c144 = arith.constant 144 : index
    %c0_106 = arith.constant 0 : index
    %228 = vector.load %arg2[%c144, %c0_106] : memref<152x96xf32, #tpu.memory_space<vmem>>, vector<1x96xf32>
    %229 = vector.broadcast %228 : vector<1x96xf32> to vector<8x96xf32>
    %230 = arith.addf %227, %229 : vector<8x96xf32>
    %cst_107 = arith.constant dense<0xFF800000> : vector<8xf32>
    %231 = vector.multi_reduction <maximumf>, %230, %cst_107 [1] : vector<8x96xf32> to vector<8xf32>
    %232 = vector.shape_cast %231 : vector<8xf32> to vector<8x1xf32>
    %233 = vector.broadcast %232 : vector<8x1xf32> to vector<8x96xf32>
    %234 = arith.subf %230, %233 : vector<8x96xf32>
    %235 = math.exp %234 : vector<8x96xf32>
    %cst_108 = arith.constant dense<0.000000e+00> : vector<8xf32>
    %236 = vector.multi_reduction <add>, %235, %cst_108 [1] : vector<8x96xf32> to vector<8xf32>
    %237 = vector.shape_cast %236 : vector<8xf32> to vector<8x1xf32>
    %cst_109 = arith.constant 3.125000e-02 : f32
    %238 = vector.broadcast %cst_109 : f32 to vector<8x1xf32>
    %239 = arith.mulf %237, %238 : vector<8x1xf32>
    %240 = vector.broadcast %239 : vector<8x1xf32> to vector<8x96xf32>
    %241 = arith.divf %235, %240 : vector<8x96xf32>
    %242 = arith.mulf %241, %217 : vector<8x96xf32>
    %243 = vector.extract_strided_slice %242 {offsets = [0, 0], sizes = [8, 32], strides = [1, 1]} : vector<8x96xf32> to vector<8x32xf32>
    %244 = vector.extract_strided_slice %242 {offsets = [0, 32], sizes = [8, 32], strides = [1, 1]} : vector<8x96xf32> to vector<8x32xf32>
    %245 = arith.addf %243, %244 : vector<8x32xf32>
    %246 = vector.extract_strided_slice %242 {offsets = [0, 64], sizes = [8, 32], strides = [1, 1]} : vector<8x96xf32> to vector<8x32xf32>
    %247 = arith.addf %245, %246 : vector<8x32xf32>
    %c0_110 = arith.constant 0 : index
    %c0_111 = arith.constant 0 : index
    %248 = vector.load %arg4[%c0_110, %c0_111] : memref<8x32xf32, #tpu.memory_space<vmem>>, vector<8x32xf32>
    tpu.vector_store %arg4[%c0_110, %c0_111], %247 {strides = array<i32>} : memref<8x32xf32, #tpu.memory_space<vmem>>, vector<8x32xf32>,
    return
  }
}

</mosaic_0001>

<bundles_post_ra>
// kernel: tpu_custom_call.1
= control target key start
LH: loop header
LB: loop body
LE: loop exit
PB: predicated region body
PF: predicated region fallthrough
CT: control target
= control target key end

     0   :  { %vm58_vm0 = vcmask 195584   ;;  %s3105_s0 = inlined_call_operand.vmem [shape: f32[1560,96], index: 0, kind: input, shape index: {}]   ;;  %s3106_s1 = inlined_call_operand.vmem [shape: f32[104,192], index: 1, kind: input, shape index: {}]   ;;  %s3107_s2 = inlined_call_operand.vmem [shape: f32[152,96], index: 2, kind: input, shape index: {}]   ;;  %s3108_s3 = inlined_call_operand.vmem [shape: f32[88,24], index: 3, kind: input, shape index: {}]   ;;  %s3109_s4 = inlined_call_operand.hbm [shape: f32[8,32], index: 4, kind: output, shape index: {}]  }
   0x1   :  { %v55_v0 = vld [vmem:[%s3105_s0 + $0x10] sm:$0xff]  ;;  %v54_v1 = vld [vmem:[%s3105_s0 + $0x8] sm:$0xff]  ;;  %v53_v2 = vld [vmem:[%s3105_s0] sm:$0xff] }
   0x2   :  { %81 = vmatpush.msra.mxu0 %v55_v0  ;;  %v1958_v3 = vld [vmem:[%s3108_s3] sm:$0xff] }
   0x4   :  { %82 = vmatpush.msra.mxu0 %v54_v1 }
   0x6   :  { %83 = vmatpush.msra.mxu0 %v53_v2 }
   0x7   :  { %1730 = vmatmul.msk.f32.vlgmr.msra.gmra.mxu0 %vm58_vm0, %v1958_v3 }
   0x8   :  { %9 = vsyncpa [#allocation3], 0  ;;  %v1965_v4 = vld [vmem:[%s3108_s3 + $0x8] sm:$0xff]  ;;  %v20_v5 = vld [vmem:[%s3108_s3 + $0x10] sm:$0xff]  ;;  %vm136_vm1 = vcmask 64512   ;;  %vm166_vm2 = vcmask 785408  }
   0x9   :  { %v134_v7 = vld [vmem:[%s3105_s0 + $0x70] sm:$0xff]  ;;  %v133_v8 = vld [vmem:[%s3105_s0 + $0x68] sm:$0xff]  ;;  %v135_v9 = vld [vmem:[%s3105_s0 + $0x78] sm:$0xff]  ;;  %vm285_vm9 = vcmask 130048   ;;  %s1917_s11 = smov 32   ;;  %s1918_s12 = smov 64  }
   0xa   :  { %177 = vmatpush.msra.mxu3 %v134_v7  ;;  %v132_v10 = vld [vmem:[%s3105_s0 + $0x60] sm:$0xff]  ;;  %158 = vmatpush.msra.mxu2 %v135_v9  ;;  %v131_v12 = vld [vmem:[%s3105_s0 + $0x58] sm:$0xff]  ;;  %v198_v13 = vld [vmem:[%s3105_s0 + $0x90] sm:$0xff]  ;;  %s1919_s13 = smov 96  }
   0xb   :  { %v26_v11 = vld [vmem:[%s3108_s3 + $0x40] sm:$0xff]  ;;  %v130_v14 = vld [vmem:[%s3105_s0 + $0x50] sm:$0xff]  ;;  %v129_v16 = vld [vmem:[%s3105_s0 + $0x48] sm:$0xff] }
   0xc   :  { %178 = vmatpush.msra.mxu3 %v133_v8  ;;  %1735 = vmatmul.msk.f32.vlgmr.msra.gmra.mxu2 %vm136_vm1, %v26_v11  ;;  %v27_v17 = vld [vmem:[%s3108_s3 + $0x48] sm:$0xff]  ;;  %v128_v18 = vld [vmem:[%s3105_s0 + $0x40] sm:$0xff]  ;;  %v127_v19 = vld [vmem:[%s3105_s0 + $0x38] sm:$0xff] }
   0xd   :  { %212 = vmatpush.msrb.mxu2 %v198_v13  ;;  %v126_v20 = vld [vmem:[%s3105_s0 + $0x30] sm:$0xff]  ;;  %v1810_v21 = vld [vmem:[%s3107_s2] ss:$0 sm:$0xff]  ;;  %v125_v23 = vld [vmem:[%s3105_s0 + $0x28] sm:$0xff] }
   0xe   :  { %179 = vmatpush.msra.mxu3 %v132_v10  ;;  %v124_v25 = vld [vmem:[%s3105_s0 + $0x20] sm:$0xff]  ;;  %v21_v28 = vld [vmem:[%s3108_s3 + $0x18] sm:$0xff]  ;;  %v197_v31 = vld [vmem:[%s3105_s0 + $0x88] sm:$0xff] }
   0xf   :  { %1731 = vmatmul.msk.f32.gmra.mxu0 %vm58_vm0, %v1965_v4  ;;  %v22_v29 = vld [vmem:[%s3108_s3 + $0x20] sm:$0xff]  ;;  %v123_v30 = vld [vmem:[%s3105_s0 + $0x18] sm:$0xff]  ;;  %213 = vmatpush.msrb.mxu2 %v197_v31  ;;  %v2045_v33 = vld [vmem:[%s3105_s0 + $0x610] sm:$0xff] }
  0x10   :  { %180 = vmatpush.msra.mxu3 %v131_v12  ;;  %v196_v32 = vld [vmem:[%s3105_s0 + $0x80] sm:$0xff]  ;;  %v2050_v34 = vld [vmem:[%s3105_s0 + $0x608] sm:$0xff]  ;;  %240 = vmatpush.msrb.mxu0 %v2045_v33  ;;  %v2064_v36 = vld [vmem:[%s3105_s0 + $0x5f8] sm:$0xff] }
  0x11   :  { %214 = vmatpush.msrb.mxu2 %v196_v32  ;;  %v2058_v35 = vld [vmem:[%s3105_s0 + $0x600] sm:$0xff]  ;;  %v2070_v37 = vld [vmem:[%s3105_s0 + $0x5f0] sm:$0xff]  ;;  %v2076_v38 = vld [vmem:[%s3105_s0 + $0x5e8] sm:$0xff] }
  0x12   :  { %181 = vmatpush.msra.mxu3 %v130_v14  ;;  %241 = vmatpush.msrb.mxu0 %v2050_v34  ;;  %v2082_v39 = vld [vmem:[%s3105_s0 + $0x5e0] sm:$0xff]  ;;  %v2091_v42 = vld [vmem:[%s3105_s0 + $0x5d8] sm:$0xff]  ;;  %v2097_v43 = vld [vmem:[%s3105_s0 + $0x5d0] sm:$0xff] }
  0x13   :  { %v2103_v44 = vld [vmem:[%s3105_s0 + $0x5c8] sm:$0xff]  ;;  %v2109_v45 = vld [vmem:[%s3105_s0 + $0x5c0] sm:$0xff]  ;;  %v2115_v46 = vld [vmem:[%s3105_s0 + $0x5b8] sm:$0xff] }
  0x14   :  { %182 = vmatpush.msra.mxu3 %v129_v16  ;;  %1736 = vmatmul.msk.f32.gmra.mxu2 %vm136_vm1, %v27_v17  ;;  %v1811_v52 = vld [vmem:[%s3107_s2 + $0x8] ss:$0 sm:$0xff]  ;;  %v25_v31 = vld [vmem:[%s3108_s3 + $0x38] sm:$0xff]  ;;  %v364_v32 = vld [vmem:[%s3105_s0 + $0xd0] sm:$0xff] }
  0x15   :  { %242 = vmatpush.msrb.mxu0 %v2058_v35 }
  0x16   :  { %183 = vmatpush.msra.mxu3 %v128_v18 }
  0x17   :  { %1732 = vmatmul.msk.f32.gmra.mxu0 %vm58_vm0, %v20_v5 }
  0x18   :  { %184 = vmatpush.msra.mxu3 %v127_v19  ;;  %243 = vmatpush.msrb.mxu0 %v2064_v36 }
  0x1a   :  { %185 = vmatpush.msra.mxu3 %v126_v20  ;;  %244 = vmatpush.msrb.mxu0 %v2070_v37 }
  0x1c   :  { %186 = vmatpush.msra.mxu3 %v125_v23  ;;  %1739 = vmatmul.msk.f32.vlgmr.msrb.gmra.mxu2 %vm58_vm0, %v1958_v3  ;;  %v368_v23 = vld [vmem:[%s3105_s0 + $0xf0] sm:$0xff] }
  0x1d   :  { %245 = vmatpush.msrb.mxu0 %v2076_v38 }
  0x1e   :  { %187 = vmatpush.msra.mxu3 %v124_v25  ;;  %v326_v25 = vld [vmem:[%s3105_s0 + $0x2b0] sm:$0xff] }
  0x1f   :  { %246 = vmatpush.msrb.mxu0 %v2082_v39  ;;  %339 = vmatpush.msra.mxu2 %v326_v25  ;;  %v429_v25 = vld [vmem:[%s3105_s0 + $0x128] sm:$0xff] }
  0x20   :  { %188 = vmatpush.msra.mxu3 %v123_v30  ;;  %v323_v30 = vld [vmem:[%s3105_s0 + $0x298] sm:$0xff] }
  0x21   :  { %247 = vmatpush.msrb.mxu0 %v2091_v42 }
  0x23   :  { %248 = vmatpush.msrb.mxu0 %v2097_v43 }
  0x24   :  { %1740 = vmatmul.msk.f32.gmra.mxu2 %vm58_vm0, %v1965_v4 }
  0x25   :  { %249 = vmatpush.msrb.mxu0 %v2103_v44 }
  0x27   :  { %250 = vmatpush.msrb.mxu0 %v2109_v45 }
  0x29   :  { %251 = vmatpush.msrb.mxu0 %v2115_v46 }
  0x84   :  { %v85_v6 = vpop.f32.mrf.mxu0 }
  0x85   :  { %v86_v27 = vadd.f32 %v1810_v21, %v85_v6 }
  0x8c   :  { %v88_v15 = vpop.f32.mrf.mxu0 }
  0x8d   :  { %v89_v26 = vadd.f32 %v1810_v21, %v88_v15 }
  0x8f   :  { %v160_v47 = vpop.f32.mrf.mxu2 }
  0x94   :  { %v91_v22 = vpop.f32.mrf.mxu0 }
  0x95   :  { %v92_v24 = vadd.f32 %v1810_v21, %v91_v22  ;;  %v24_v22 = vld [vmem:[%s3108_s3 + $0x30] sm:$0xff] }
  0x97   :  { %113 = vmatpush.msra.mxu1 %v92_v24  ;;  %v163_v48 = vpop.f32.mrf.mxu2  ;;  %v367_v24 = vld [vmem:[%s3105_s0 + $0xe8] sm:$0xff] }
  0x99   :  { %114 = vmatpush.msra.mxu1 %v89_v26  ;;  %v325_v26 = vld [vmem:[%s3105_s0 + $0x2a8] sm:$0xff] }
  0x9a   :  { %340 = vmatpush.msra.mxu2 %v325_v26  ;;  %v428_v26 = vld [vmem:[%s3105_s0 + $0x120] sm:$0xff] }
  0x9b   :  { %115 = vmatpush.msra.mxu1 %v86_v27  ;;  %v366_v27 = vld [vmem:[%s3105_s0 + $0xe0] sm:$0xff] }
  0x9c   :  { %1733 = vmatmul.msk.f32.vlgmr.msra.gmra.mxu1 %vm58_vm0, %v21_v28  ;;  %v324_v28 = vld [vmem:[%s3105_s0 + $0x2a0] sm:$0xff] }
  0x9d   :  { %341 = vmatpush.msra.mxu2 %v324_v28  ;;  %v426_v28 = vld [vmem:[%s3105_s0 + $0x110] sm:$0xff] }
  0x9f   :  { %v216_v49 = vpop.f32.mrf.mxu2  ;;  %342 = vmatpush.msra.mxu2 %v323_v30 }
  0xa4   :  { %1734 = vmatmul.msk.f32.gmra.mxu1 %vm58_vm0, %v22_v29  ;;  %v365_v29 = vld [vmem:[%s3105_s0 + $0xd8] sm:$0xff] }
  0xa7   :  { %v219_v57 = vpop.f32.mrf.mxu2 }
 0x119   :  { %v117_v40 = vpop.f32.mrf.mxu1 }
 0x11a   :  { %1737 = vmatmul.msk.f32.vlgmr.msra.gmra.mxu3 %vm166_vm2, %v117_v40  ;;  %v322_v40 = vld [vmem:[%s3105_s0 + $0x290] sm:$0xff] }
 0x11b   :  { %343 = vmatpush.msra.mxu2 %v322_v40  ;;  %v1814_v40 = vld [vmem:[%s3107_s2 + $0x20] ss:$0 sm:$0xff] }
 0x121   :  { %v120_v41 = vpop.f32.mrf.mxu1 }
 0x122   :  { %1738 = vmatmul.msk.f32.gmra.mxu3 %vm166_vm2, %v120_v41  ;;  %v363_v41 = vld [vmem:[%s3105_s0 + $0xc8] sm:$0xff] }
 0x19d   :  { %v190_v50 = vpop.f32.mrf.mxu3 }
 0x19e   :  { %v191_v51 = vadd.f32 %v190_v50, %v160_v47  ;;  %v321_v47 = vld [vmem:[%s3105_s0 + $0x288] sm:$0xff]  ;;  %v361_v50 = vld [vmem:[%s3105_s0 + $0xb8] sm:$0xff] }
 0x19f   :  { %344 = vmatpush.msra.mxu2 %v321_v47 }
 0x1a0   :  { %v222_v53 = vadd.f32 %v216_v49, %v191_v51  ;;  %v320_v49 = vld [vmem:[%s3105_s0 + $0x280] sm:$0xff]  ;;  %v319_v51 = vld [vmem:[%s3105_s0 + $0x278] sm:$0xff] }
 0x1a1   :  { %345 = vmatpush.msra.mxu2 %v320_v49 }
 0x1a2   :  { %v226_v54 = vadd.f32 %v1811_v52, %v222_v53  ;;  %v318_v53 = vld [vmem:[%s3105_s0 + $0x270] sm:$0xff] }
 0x1a3   :  { %346 = vmatpush.msra.mxu2 %v319_v51  ;;  %v28_v51 = vld [vmem:[%s3108_s3 + $0x50] sm:$0xff] }
 0x1a4   :  { %v228_v55 = vmul.f32 %v226_v54, %v226_v54 }
 0x1a5   :  { %v193_v56 = vpop.f32.mrf.mxu3  ;;  %347 = vmatpush.msra.mxu2 %v318_v53  ;;  %v613_v53 = vld [vmem:[%s3105_s0 + $0x230] sm:$0xff] }
 0x1a6   :  { %v194_v58 = vadd.f32 %v193_v56, %v163_v48  ;;  %1741 = vmatmul.msk.f32.vlgmr.msrb.gmra.mxu0 %vm166_vm2, %v228_v55  ;;  %v362_v48 = vld [vmem:[%s3105_s0 + $0xc0] sm:$0xff]  ;;  %v317_v55 = vld [vmem:[%s3105_s0 + $0x268] sm:$0xff] }
 0x1a7   :  { %v358_v56 = vld [vmem:[%s3105_s0 + $0xa0] sm:$0xff]  ;;  %348 = vmatpush.msra.mxu2 %v317_v55 }
 0x1a8   :  { %v223_v59 = vadd.f32 %v219_v57, %v194_v58  ;;  %v316_v57 = vld [vmem:[%s3105_s0 + $0x260] sm:$0xff]  ;;  %v357_v58 = vld [vmem:[%s3105_s0 + $0x98] sm:$0xff] }
 0x1a9   :  { %349 = vmatpush.msra.mxu2 %v316_v57  ;;  %v611_v55 = vld [vmem:[%s3105_s0 + $0x220] sm:$0xff] }
 0x1aa   :  { %v227_v60 = vadd.f32 %v1811_v52, %v223_v59  ;;  %v360_v52 = vld [vmem:[%s3105_s0 + $0xb0] sm:$0xff]  ;;  %v315_v59 = vld [vmem:[%s3105_s0 + $0x258] sm:$0xff] }
 0x1ab   :  { %350 = vmatpush.msra.mxu2 %v315_v59  ;;  %v608_v59 = vld [vmem:[%s3105_s0 + $0x208] sm:$0xff] }
 0x1ac   :  { %v229_v61 = vmul.f32 %v227_v60, %v227_v60 }
 0x1ae   :  { %1742 = vmatmul.msk.f32.gmra.mxu0 %vm166_vm2, %v229_v61  ;;  %v492_v61 = vld [vmem:[%s3105_s0 + $0x1b0] sm:$0xff] }
 0x223   :  { %v253_v62 = vpop.f32.mrf.mxu0 }
 0x224   :  { %v259_v63 = vmax.f32 %v253_v62, 1e-24  ;;  %v491_v62 = vld [vmem:[%s3105_s0 + $0x1a8] sm:$0xff] }
 0x226   :  { %1829 = vrsqrt.f32 %v259_v63  ;;  %vm267_vm4 = vweird.f32 %v259_v63 }
 0x22b   :  { %v256_v0 = vpop.f32.mrf.mxu0 }
 0x22c   :  { %v1830_v1 = vpop.eup %1829  ;;  %v260_v2 = vmax.f32 %v256_v0, 1e-24  ;;  %v489_v0 = vld [vmem:[%s3105_s0 + $0x198] sm:$0xff] }
 0x22d   :  { %v262_v5 = vmul.f32 %v1830_v1, %v259_v63  ;;  %vm268_vm3 = vweird.f32 %v1830_v1  ;;  %v490_v63 = vld [vmem:[%s3105_s0 + $0x1a0] sm:$0xff] }
 0x22e   :  { %1831 = vrsqrt.f32 %v260_v2  ;;  %vm269_vm6 = vmor %vm267_vm4, %vm268_vm3  ;;  %vm277_vm7 = vweird.f32 %v260_v2 }
 0x22f   :  { %v263_v6 = vmul.f32 %v1830_v1, %v262_v5  ;;  %v486_v5 = vld [vmem:[%s3105_s0 + $0x180] sm:$0xff] }
 0x231   :  { %v264_v7 = vmul.f32 0.5, %v263_v6  ;;  %v485_v6 = vld [vmem:[%s3105_s0 + $0x178] sm:$0xff] }
 0x233   :  { %v265_v9 = vsub.f32 1.5, %v264_v7  ;;  %v484_v7 = vld [vmem:[%s3105_s0 + $0x170] sm:$0xff] }
 0x234   :  { %v1832_v8 = vpop.eup %1831 }
 0x235   :  { %v272_v10 = vmul.f32 %v1832_v8, %v260_v2  ;;  %v266_v13 = vmul.f32 %v1830_v1, %v265_v9  ;;  %vm278_vm5 = vweird.f32 %v1832_v8  ;;  %v487_v2 = vld [vmem:[%s3105_s0 + $0x188] sm:$0xff]  ;;  %v482_v9 = vld [vmem:[%s3105_s0 + $0x160] sm:$0xff] }
 0x236   :  { %vm279_vm8 = vmor %vm277_vm7, %vm278_vm5 }
 0x237   :  { %v273_v11 = vmul.f32 %v1832_v8, %v272_v10  ;;  %v270_v16 = vsel %vm269_vm6, %v1830_v1, %v266_v13  ;;  %v488_v1 = vld [vmem:[%s3105_s0 + $0x190] sm:$0xff]  ;;  %v554_v13 = vld [vmem:[%s3105_s0 + $0x1c0] sm:$0xff] }
 0x238   :  { %v281_v19 = vmul.f32 %v270_v16, %v226_v54  ;;  %v359_v54 = vld [vmem:[%s3105_s0 + $0xa8] sm:$0xff]  ;;  %v556_v10 = vld [vmem:[%s3105_s0 + $0x1d0] sm:$0xff] }
 0x239   :  { %v274_v12 = vmul.f32 0.5, %v273_v11  ;;  %v555_v11 = vld [vmem:[%s3105_s0 + $0x1c8] sm:$0xff]  ;;  %v1812_v16 = vld [vmem:[%s3107_s2 + $0x10] ss:$0 sm:$0xff] }
 0x23a   :  { %v2128_v21 = vmax.f32 %v281_v19, 0.0 }
 0x23b   :  { %v275_v14 = vsub.f32 1.5, %v274_v12 }
 0x23d   :  { %v276_v15 = vmul.f32 %v1832_v8, %v275_v14 }
 0x23f   :  { %v280_v17 = vsel %vm279_vm8, %v1832_v8, %v276_v15  ;;  %v483_v8 = vld [vmem:[%s3105_s0 + $0x168] sm:$0xff] }
 0x240   :  { %v2123_v18 = vmul.f32 %v280_v17, %v227_v60  ;;  %v493_v60 = vld [vmem:[%s3105_s0 + $0x1b8] sm:$0xff] }
 0x241   :  { %498 = vmatpush.msrb.mxu2 %v493_v60  ;;  %v607_v60 = vld [vmem:[%s3105_s0 + $0x200] sm:$0xff] }
 0x242   :  { %v284_v20 = vmax.f32 %v2123_v18, 0.0 }
 0x243   :  { %499 = vmatpush.msrb.mxu2 %v492_v61  ;;  %v606_v61 = vld [vmem:[%s3105_s0 + $0x1f8] sm:$0xff] }
 0x244   :  { %306 = vmatpush.msrb.mxu1 %v284_v20 }
 0x245   :  { %500 = vmatpush.msrb.mxu2 %v491_v62  ;;  %v614_v62 = vld [vmem:[%s3105_s0 + $0x238] sm:$0xff] }
 0x246   :  { %307 = vmatpush.msrb.mxu1 %v2128_v21 }
 0x247   :  { %1743 = vmatmul.msk.f32.vlgmr.msrb.gmra.mxu1 %vm285_vm9, %v24_v22  ;;  %501 = vmatpush.msrb.mxu2 %v490_v63  ;;  %v432_v22 = vld [vmem:[%s3105_s0 + $0x140] sm:$0xff]  ;;  %v605_v63 = vld [vmem:[%s3105_s0 + $0x1f0] sm:$0xff] }
 0x248   :  { %381 = vmatpush.msra.mxu1 %v368_v23  ;;  %v431_v23 = vld [vmem:[%s3105_s0 + $0x138] sm:$0xff] }
 0x249   :  { %502 = vmatpush.msrb.mxu2 %v489_v0  ;;  %v604_v0 = vld [vmem:[%s3105_s0 + $0x1e8] sm:$0xff] }
 0x24a   :  { %382 = vmatpush.msra.mxu1 %v367_v24  ;;  %v430_v24 = vld [vmem:[%s3105_s0 + $0x130] sm:$0xff] }
 0x24b   :  { %503 = vmatpush.msrb.mxu2 %v488_v1  ;;  %v603_v1 = vld [vmem:[%s3105_s0 + $0x1e0] sm:$0xff] }
 0x24c   :  { %383 = vmatpush.msra.mxu1 %v366_v27  ;;  %v427_v27 = vld [vmem:[%s3105_s0 + $0x118] sm:$0xff] }
 0x24d   :  { %504 = vmatpush.msrb.mxu2 %v487_v2  ;;  %v660_v2 = vld [vmem:[%s3105_s0 + $0x250] sm:$0xff] }
 0x24e   :  { %384 = vmatpush.msra.mxu1 %v365_v29  ;;  %v425_v29 = vld [vmem:[%s3105_s0 + $0x108] sm:$0xff] }
 0x24f   :  { %1744 = vmatmul.msk.f32.gmra.mxu1 %vm285_vm9, %v25_v31  ;;  %505 = vmatpush.msrb.mxu2 %v486_v5  ;;  %v424_v31 = vld [vmem:[%s3105_s0 + $0x100] sm:$0xff]  ;;  %v659_v5 = vld [vmem:[%s3105_s0 + $0x248] sm:$0xff] }
 0x250   :  { %385 = vmatpush.msra.mxu1 %v364_v32 }
 0x251   :  { %506 = vmatpush.msrb.mxu2 %v485_v6  ;;  %v602_v6 = vld [vmem:[%s3105_s0 + $0x1d8] sm:$0xff] }
 0x252   :  { %386 = vmatpush.msra.mxu1 %v363_v41  ;;  %v423_v41 = vld [vmem:[%s3105_s0 + $0xf8] sm:$0xff] }
 0x253   :  { %507 = vmatpush.msrb.mxu2 %v484_v7  ;;  %v658_v7 = vld [vmem:[%s3105_s0 + $0x240] sm:$0xff] }
 0x254   :  { %387 = vmatpush.msra.mxu1 %v362_v48 }
 0x255   :  { %508 = vmatpush.msrb.mxu2 %v483_v8 }
 0x256   :  { %388 = vmatpush.msra.mxu1 %v361_v50  ;;  %v435_v50 = vld [vmem:[%s3105_s0 + $0x158] sm:$0xff] }
 0x257   :  { %509 = vmatpush.msrb.mxu2 %v482_v9  ;;  %454 = vmatpush.msra.mxu0 %v435_v50  ;;  %v862_v50 = vld [vmem:[%s3105_s0 + $0x3d0] sm:$0xff] }
 0x258   :  { %389 = vmatpush.msra.mxu1 %v360_v52  ;;  %1750 = vmatmul.msk.f32.vlgmr.msra.gmra.mxu0 %vm136_vm1, %v28_v51 }
 0x259   :  { %526 = vmatpush.msrb.mxu0 %v2045_v33 }
 0x25a   :  { %390 = vmatpush.msra.mxu1 %v359_v54  ;;  %v612_v54 = vld [vmem:[%s3105_s0 + $0x228] sm:$0xff] }
 0x25b   :  { %527 = vmatpush.msrb.mxu0 %v2050_v34 }
 0x25c   :  { %391 = vmatpush.msra.mxu1 %v358_v56  ;;  %v610_v56 = vld [vmem:[%s3105_s0 + $0x218] sm:$0xff] }
 0x25d   :  { %528 = vmatpush.msrb.mxu0 %v2058_v35 }
 0x25e   :  { %392 = vmatpush.msra.mxu1 %v357_v58  ;;  %v609_v58 = vld [vmem:[%s3105_s0 + $0x210] sm:$0xff] }
 0x25f   :  { %1747 = vmatmul.msk.f32.vlgmr.msra.gmra.mxu1 %vm166_vm2, %v2128_v21  ;;  %529 = vmatpush.msrb.mxu0 %v2064_v36 }
 0x260   :  { %572 = vmatpush.msrb.mxu1 %v556_v10 }
 0x261   :  { %530 = vmatpush.msrb.mxu0 %v2070_v37 }
 0x262   :  { %573 = vmatpush.msrb.mxu1 %v555_v11  ;;  %v1815_v11 = vld [vmem:[%s3107_s2 + $0x18] ss:$0 sm:$0xff] }
 0x263   :  { %531 = vmatpush.msrb.mxu0 %v2076_v38 }
 0x264   :  { %574 = vmatpush.msrb.mxu1 %v554_v13 }
 0x265   :  { %532 = vmatpush.msrb.mxu0 %v2082_v39 }
 0x266   :  { %642 = vmatpush.msra.mxu1 %v613_v53  ;;  %v771_v53 = vld [vmem:[%s3105_s0 + $0x300] sm:$0xff] }
 0x267   :  { %1748 = vmatmul.msk.f32.gmra.mxu1 %vm166_vm2, %v284_v20  ;;  %v2275_v20 = vld [vmem:[%s3108_s3 + $0x28] sm:$0xff]  ;;  %533 = vmatpush.msrb.mxu0 %v2091_v42  ;;  %s1721_s3 = sshll.u32 %s3109_s4, 4  ;;  %s1722_s3 = int_to_ptr.hbm [resolvable:$true] %s1721_s3 }
 0x268   :  { %643 = vmatpush.msra.mxu1 %v612_v54  ;;  %v820_v54 = vld [vmem:[%s3105_s0 + $0x360] sm:$0xff] }
 0x269   :  { %534 = vmatpush.msrb.mxu0 %v2097_v43 }
 0x26a   :  { %644 = vmatpush.msra.mxu1 %v611_v55  ;;  %v860_v55 = vld [vmem:[%s3105_s0 + $0x3c0] sm:$0xff] }
 0x26b   :  { %535 = vmatpush.msrb.mxu0 %v2103_v44 }
 0x26c   :  { %645 = vmatpush.msra.mxu1 %v610_v56  ;;  %v770_v56 = vld [vmem:[%s3105_s0 + $0x2f8] sm:$0xff] }
 0x26d   :  { %536 = vmatpush.msrb.mxu0 %v2109_v45 }
 0x26e   :  { %646 = vmatpush.msra.mxu1 %v609_v58  ;;  %v859_v58 = vld [vmem:[%s3105_s0 + $0x3b8] sm:$0xff] }
 0x26f   :  { %1754 = vmatmul.msk.f32.vlgmr.msrb.gmra.mxu1 %vm58_vm0, %v1958_v3  ;;  %537 = vmatpush.msrb.mxu0 %v2115_v46 }
 0x270   :  { %647 = vmatpush.msra.mxu1 %v608_v59  ;;  %v769_v59 = vld [vmem:[%s3105_s0 + $0x2f0] sm:$0xff] }
 0x271   :  { %674 = vmatpush.msra.mxu0 %v660_v2  ;;  %v816_v2 = vld [vmem:[%s3105_s0 + $0x340] sm:$0xff] }
 0x272   :  { %648 = vmatpush.msra.mxu1 %v607_v60  ;;  %v818_v60 = vld [vmem:[%s3105_s0 + $0x350] sm:$0xff] }
 0x273   :  { %675 = vmatpush.msra.mxu0 %v659_v5  ;;  %v856_v5 = vld [vmem:[%s3105_s0 + $0x3a0] sm:$0xff] }
 0x274   :  { %649 = vmatpush.msra.mxu1 %v606_v61  ;;  %v858_v61 = vld [vmem:[%s3105_s0 + $0x3b0] sm:$0xff] }
 0x275   :  { %676 = vmatpush.msra.mxu0 %v658_v7  ;;  %v815_v7 = vld [vmem:[%s3105_s0 + $0x338] sm:$0xff] }
 0x276   :  { %650 = vmatpush.msra.mxu1 %v605_v63  ;;  %v817_v63 = vld [vmem:[%s3105_s0 + $0x348] sm:$0xff] }
 0x277   :  { %1755 = vmatmul.msk.f32.gmra.mxu1 %vm58_vm0, %v1965_v4  ;;  %v434_v4 = vld [vmem:[%s3105_s0 + $0x150] sm:$0xff] }
 0x278   :  { %651 = vmatpush.msra.mxu1 %v604_v0  ;;  %v857_v0 = vld [vmem:[%s3105_s0 + $0x3a8] sm:$0xff] }
 0x27a   :  { %652 = vmatpush.msra.mxu1 %v603_v1  ;;  %v767_v1 = vld [vmem:[%s3105_s0 + $0x2e0] sm:$0xff] }
 0x27c   :  { %653 = vmatpush.msra.mxu1 %v602_v6  ;;  %v766_v6 = vld [vmem:[%s3105_s0 + $0x2d8] sm:$0xff] }
 0x27e   :  { %869 = vmatpush.msrb.mxu1 %v862_v50  ;;  %v39_v50 = vld [vmem:[%s3105_s0 + $0x5a8] sm:$0xff] }
 0x2c4   :  { %v309_v12 = vpop.f32.mrf.mxu1 }
 0x2c5   :  { %1745 = vmatmul.msk.f32.vlgmr.msra.gmra.mxu2 %vm166_vm2, %v309_v12 }
 0x2c6   :  { %630 = vmatpush.msra.mxu2 %v614_v62  ;;  %v768_v62 = vld [vmem:[%s3105_s0 + $0x2e8] sm:$0xff] }
 0x2cc   :  { %v312_v14 = vpop.f32.mrf.mxu1 }
 0x2cd   :  { %1746 = vmatmul.msk.f32.gmra.mxu2 %vm166_vm2, %v312_v14 }
 0x2d5   :  { %1752 = vmatmul.msk.f32.vlgmr.msrb.gmra.mxu2 %vm166_vm2, %v2128_v21  ;;  %v433_v21 = vld [vmem:[%s3105_s0 + $0x148] sm:$0xff]  ;;  %v456_v8 = vpop.f32.mrf.mxu0 }
 0x2dc   :  { %v394_v15 = vpop.f32.mrf.mxu1 }
 0x2dd   :  { %v395_v19 = vadd.f32 %v1812_v16, %v394_v15  ;;  %1757 = vmatmul.msk.f32.vlgmr.msra.gmra.mxu2 %vm136_vm1, %v28_v51  ;;  %v821_v51 = vld [vmem:[%s3105_s0 + $0x368] sm:$0xff]  ;;  %vm758_vm1 = vcmask 523264  }
 0x2e4   :  { %v397_v17 = vpop.f32.mrf.mxu1 }
 0x2e5   :  { %v398_v18 = vadd.f32 %v1812_v16, %v397_v17 }
 0x2e7   :  { %417 = vmatpush.msrb.mxu3 %v398_v18 }
 0x2e9   :  { %418 = vmatpush.msrb.mxu3 %v395_v19 }
 0x2ea   :  { %1749 = vmatmul.msk.f32.vlgmr.msrb.gmra.mxu3 %vm285_vm9, %v2275_v20 }
 0x2eb   :  { %466 = vmatpush.msra.mxu3 %v434_v4 }
 0x2ec   :  { %v576_v30 = vpop.f32.mrf.mxu1 }
 0x2ed   :  { %467 = vmatpush.msra.mxu3 %v433_v21  ;;  %v577_v48 = vadd.f32 %v1814_v40, %v576_v30  ;;  %v1816_v21 = vld [vmem:[%s3107_s2 + $0x28] ss:$0 sm:$0xff] }
 0x2ef   :  { %468 = vmatpush.msra.mxu3 %v432_v22 }
 0x2f1   :  { %469 = vmatpush.msra.mxu3 %v431_v23 }
 0x2f3   :  { %470 = vmatpush.msra.mxu3 %v430_v24 }
 0x2f4   :  { %v579_v47 = vpop.f32.mrf.mxu1 }
 0x2f5   :  { %471 = vmatpush.msra.mxu3 %v429_v25  ;;  %v580_v49 = vadd.f32 %v1814_v40, %v579_v47 }
 0x2f7   :  { %472 = vmatpush.msra.mxu3 %v428_v26 }
 0x2f9   :  { %473 = vmatpush.msra.mxu3 %v427_v27 }
 0x2fb   :  { %474 = vmatpush.msra.mxu3 %v426_v28 }
 0x2fd   :  { %475 = vmatpush.msra.mxu3 %v425_v29 }
 0x2ff   :  { %476 = vmatpush.msra.mxu3 %v424_v31 }
 0x301   :  { %477 = vmatpush.msra.mxu3 %v423_v41  ;;  %v1813_v41 = vld [vmem:[%s3107_s2 + $0x30] ss:$0 sm:$0xff] }
 0x303   :  { %596 = vmatpush.msrb.mxu3 %v580_v49  ;;  %v822_v49 = vld [vmem:[%s3105_s0 + $0x370] sm:$0xff] }
 0x305   :  { %597 = vmatpush.msrb.mxu3 %v577_v48  ;;  %v773_v48 = vld [vmem:[%s3105_s0 + $0x310] sm:$0xff] }
 0x306   :  { %789 = vmatpush.msrb.mxu2 %v773_v48 }
 0x348   :  { %v2312_v32 = vpop.f32.mrf.mxu2 }
 0x349   :  { %v353_v47 = vadd.f32 %v1813_v41, %v2312_v32  ;;  %v772_v32 = vld [vmem:[%s3105_s0 + $0x308] sm:$0xff] }
 0x34a   :  { %790 = vmatpush.msrb.mxu2 %v772_v32  ;;  %v38_v32 = vld [vmem:[%s3105_s0 + $0x5a0] sm:$0xff] }
 0x34c   :  { %791 = vmatpush.msrb.mxu2 %v771_v53  ;;  %v35_v53 = vld [vmem:[%s3105_s0 + $0x588] sm:$0xff] }
 0x34e   :  { %792 = vmatpush.msrb.mxu2 %v770_v56 }
 0x350   :  { %v355_v52 = vpop.f32.mrf.mxu2  ;;  %793 = vmatpush.msrb.mxu2 %v769_v59  ;;  %v34_v59 = vld [vmem:[%s3105_s0 + $0x580] sm:$0xff] }
 0x351   :  { %v861_v52 = vld [vmem:[%s3105_s0 + $0x3c8] sm:$0xff] }
 0x352   :  { %870 = vmatpush.msrb.mxu1 %v861_v52  ;;  %794 = vmatpush.msrb.mxu2 %v768_v62  ;;  %v36_v52 = vld [vmem:[%s3105_s0 + $0x590] sm:$0xff] }
 0x354   :  { %871 = vmatpush.msrb.mxu1 %v860_v55  ;;  %795 = vmatpush.msrb.mxu2 %v767_v1 }
 0x356   :  { %872 = vmatpush.msrb.mxu1 %v859_v58  ;;  %796 = vmatpush.msrb.mxu2 %v766_v6  ;;  %v30_v6 = vld [vmem:[%s3105_s0 + $0x560] sm:$0xff] }
 0x358   :  { %v511_v12 = vpop.f32.mrf.mxu2  ;;  %873 = vmatpush.msrb.mxu1 %v858_v61 }
 0x35a   :  { %874 = vmatpush.msrb.mxu1 %v857_v0 }
 0x35c   :  { %875 = vmatpush.msrb.mxu1 %v856_v5  ;;  %v31_v5 = vld [vmem:[%s3105_s0 + $0x568] sm:$0xff] }
 0x360   :  { %v632_v19 = vpop.f32.mrf.mxu2 }
 0x36d   :  { %v420_v57 = vpop.f32.mrf.mxu3 }
 0x36e   :  { %1751 = vmatmul.msk.f32.vlgmr.msra.gmra.mxu3 %vm166_vm2, %v420_v57  ;;  %v819_v57 = vld [vmem:[%s3105_s0 + $0x358] sm:$0xff] }
 0x36f   :  { %693 = vmatpush.msra.mxu3 %v2045_v33 }
 0x371   :  { %694 = vmatpush.msra.mxu3 %v2050_v34 }
 0x373   :  { %695 = vmatpush.msra.mxu3 %v2058_v35 }
 0x375   :  { %696 = vmatpush.msra.mxu3 %v2064_v36 }
 0x376   :  { %1756 = vmatmul.msk.f32.vlgmr.msrb.gmra.mxu3 %vm285_vm9, %v2275_v20 }
 0x377   :  { %697 = vmatpush.msra.mxu3 %v2070_v37 }
 0x379   :  { %698 = vmatpush.msra.mxu3 %v2076_v38 }
 0x37b   :  { %699 = vmatpush.msra.mxu3 %v2082_v39 }
 0x37d   :  { %700 = vmatpush.msra.mxu3 %v2091_v42 }
 0x37f   :  { %701 = vmatpush.msra.mxu3 %v2097_v43 }
 0x381   :  { %702 = vmatpush.msra.mxu3 %v2103_v44 }
 0x383   :  { %703 = vmatpush.msra.mxu3 %v2109_v45 }
 0x385   :  { %704 = vmatpush.msra.mxu3 %v2115_v46 }
 0x3f1   :  { %v479_v9 = vpop.f32.mrf.mxu3 }
 0x3f2   :  { %v480_v10 = vadd.f32 %v479_v9, %v456_v8  ;;  %v855_v8 = vld [vmem:[%s3105_s0 + $0x398] sm:$0xff]  ;;  %v765_v9 = vld [vmem:[%s3105_s0 + $0x2d0] sm:$0xff] }
 0x3f3   :  { %876 = vmatpush.msrb.mxu1 %v855_v8  ;;  %797 = vmatpush.msrb.mxu2 %v765_v9 }
 0x3f4   :  { %v514_v13 = vadd.f32 %v511_v12, %v480_v10  ;;  %v814_v10 = vld [vmem:[%s3105_s0 + $0x330] sm:$0xff]  ;;  %v764_v12 = vld [vmem:[%s3105_s0 + $0x2c8] sm:$0xff] }
 0x3f5   :  { %798 = vmatpush.msrb.mxu2 %v764_v12 }
 0x3f6   :  { %v517_v14 = vadd.f32 %v1815_v11, %v514_v13  ;;  %v854_v11 = vld [vmem:[%s3105_s0 + $0x390] sm:$0xff]  ;;  %v813_v13 = vld [vmem:[%s3105_s0 + $0x328] sm:$0xff] }
 0x3f7   :  { %877 = vmatpush.msrb.mxu1 %v854_v11 }
 0x3f8   :  { %v518_v15 = vmul.f32 %v517_v14, %v517_v14 }
 0x3f9   :  { %v599_v16 = vpop.f32.mrf.mxu3 }
 0x3fa   :  { %1753 = vmatmul.msk.f32.vlgmr.msrb.gmra.mxu0 %vm166_vm2, %v518_v15  ;;  %1758 = vmatmul.msk.f32.vlgmr.msra.gmra.mxu1 %vm166_vm2, %v599_v16  ;;  %v763_v15 = vld [vmem:[%s3105_s0 + $0x2c0] sm:$0xff] }
 0x3fb   :  { %829 = vmatpush.msrb.mxu0 %v822_v49  ;;  %v812_v16 = vld [vmem:[%s3105_s0 + $0x320] sm:$0xff]  ;;  %799 = vmatpush.msrb.mxu2 %v763_v15 }
 0x3fd   :  { %830 = vmatpush.msrb.mxu0 %v821_v51  ;;  %v37_v51 = vld [vmem:[%s3105_s0 + $0x598] sm:$0xff] }
 0x3ff   :  { %831 = vmatpush.msrb.mxu0 %v820_v54 }
 0x401   :  { %832 = vmatpush.msrb.mxu0 %v819_v57 }
 0x402   :  { %1759 = vmatmul.msk.f32.vlgmr.msra.gmra.mxu0 %vm58_vm0, %v1958_v3  ;;  %vm754_vm0 = vcmask 261120  }
 0x403   :  { %833 = vmatpush.msrb.mxu0 %v818_v60  ;;  %v33_v60 = vld [vmem:[%s3105_s0 + $0x578] sm:$0xff] }
 0x405   :  { %834 = vmatpush.msrb.mxu0 %v817_v63  ;;  %v32_v63 = vld [vmem:[%s3105_s0 + $0x570] sm:$0xff] }
 0x407   :  { %835 = vmatpush.msrb.mxu0 %v816_v2 }
 0x409   :  { %836 = vmatpush.msrb.mxu0 %v815_v7  ;;  %v29_v7 = vld [vmem:[%s3105_s0 + $0x558] sm:$0xff] }
 0x40b   :  { %837 = vmatpush.msrb.mxu0 %v814_v10 }
 0x40d   :  { %838 = vmatpush.msrb.mxu0 %v813_v13 }
 0x40f   :  { %839 = vmatpush.msrb.mxu0 %v812_v16 }
 0x477   :  { %v539_v17 = vpop.f32.mrf.mxu0  ;;  %v655_v20 = vpop.f32.mrf.mxu1 }
 0x478   :  { %v542_v18 = vmax.f32 %v539_v17, 1e-24  ;;  %v656_v4 = vadd.f32 %v655_v20, %v632_v19  ;;  %v852_v17 = vld [vmem:[%s3105_s0 + $0x380] sm:$0xff]  ;;  %v811_v19 = vld [vmem:[%s3105_s0 + $0x318] sm:$0xff] }
 0x479   :  { %v851_v20 = vld [vmem:[%s3105_s0 + $0x378] sm:$0xff]  ;;  %840 = vmatpush.msrb.mxu0 %v811_v19  ;;  %v1124_v19 = vld [vmem:[%s3105_s0 + $0x430] sm:$0xff] }
 0x47a   :  { %1833 = vrsqrt.f32 %v542_v18  ;;  %vm549_vm11 = vweird.f32 %v542_v18 }
 0x47f   :  { %v678_v22 = vpop.f32.mrf.mxu0 }
 0x480   :  { %v1834_v23 = vpop.eup %1833  ;;  %v681_v24 = vadd.f32 %v678_v22, %v656_v4 }
 0x481   :  { %v544_v25 = vmul.f32 %v1834_v23, %v542_v18  ;;  %vm550_vm10 = vweird.f32 %v1834_v23  ;;  %v762_v18 = vld [vmem:[%s3105_s0 + $0x2b8] sm:$0xff] }
 0x482   :  { %v2413_v26 = vadd.f32 %v1816_v21, %v681_v24  ;;  %vm551_vm12 = vmor %vm549_vm11, %vm550_vm10  ;;  %800 = vmatpush.msrb.mxu2 %v762_v18 }
 0x483   :  { %v545_v27 = vmul.f32 %v1834_v23, %v544_v25 }
 0x484   :  { %v685_v3 = vmul.f32 %v2413_v26, %v2413_v26 }
 0x485   :  { %v546_v28 = vmul.f32 0.5, %v545_v27 }
 0x486   :  { %1760 = vmatmul.msk.f32.vlgmr.msra.gmra.mxu3 %vm166_vm2, %v685_v3 }
 0x487   :  { %v547_v29 = vsub.f32 1.5, %v546_v28 }
 0x489   :  { %v548_v30 = vmul.f32 %v1834_v23, %v547_v29 }
 0x48b   :  { %v552_v31 = vsel %vm551_vm12, %v1834_v23, %v548_v30 }
 0x48c   :  { %v553_v40 = vmul.f32 %v552_v31, %v517_v14  ;;  %v853_v14 = vld [vmem:[%s3105_s0 + $0x388] sm:$0xff] }
 0x48d   :  { %878 = vmatpush.msrb.mxu1 %v853_v14 }
 0x48e   :  { %738 = vrot.lane.b32.xlu2 %v553_v40, %s1917_s11  ;;  %731 = vrot.lane.b32.xlu1 %v553_v40, %s1918_s12 }
 0x48f   :  { %729 = vrot.lane.b32.xlu0 %v553_v40, %s1919_s13  ;;  %879 = vmatpush.msrb.mxu1 %v852_v17 }
 0x491   :  { %880 = vmatpush.msrb.mxu1 %v851_v20  ;;  %v1123_v20 = vld [vmem:[%s3105_s0 + $0x428] sm:$0xff] }
 0x493   :  { %1140 = vmatpush.msra.mxu1 %v1124_v19 }
 0x495   :  { %1141 = vmatpush.msra.mxu1 %v1123_v20 }
 0x496   :  { %736 = vrot.lane.b32.xlu1 %v353_v47, %s1918_s12 }
 0x497   :  { %734 = vrot.lane.b32.xlu0 %v353_v47, %s1919_s13 }
 0x4e8   :  { %v739_v47 = vpop.permute.xlu2 %738 }
 0x500   :  { %v732_v21 = vpop.permute.xlu1 %731 }
 0x501   :  { %v730_v4 = vpop.permute.xlu0 %729 }
 0x502   :  { %740 = vrot.lane.b32.xlu0 %v730_v4, %s1917_s11  ;;  %v1122_v4 = vld [vmem:[%s3105_s0 + $0x420] sm:$0xff] }
 0x503   :  { %1142 = vmatpush.msra.mxu1 %v1122_v4 }
 0x508   :  { %v737_v25 = vpop.permute.xlu1 %736 }
 0x509   :  { %v735_v22 = vpop.permute.xlu0 %734  ;;  %v706_v23 = vpop.f32.mrf.mxu3 }
 0x50a   :  { %v709_v24 = vmax.f32 %v706_v23, 1e-24  ;;  %742 = vrot.lane.b32.xlu0 %v732_v21, %s1917_s11  ;;  %747 = vrot.lane.b32.xlu1 %v735_v22, %s1918_s12  ;;  %v1121_v22 = vld [vmem:[%s3105_s0 + $0x418] sm:$0xff] }
 0x50b   :  { %1143 = vmatpush.msra.mxu1 %v1121_v22  ;;  %v1818_v22 = vld [vmem:[%s3107_s2 + $0x48] ss:$0 sm:$0xff] }
 0x50c   :  { %1835 = vrsqrt.f32 %v709_v24  ;;  %vm716_vm14 = vweird.f32 %v709_v24 }
 0x512   :  { %v1836_v27 = vpop.eup %1835  ;;  %749 = vrot.lane.b32.xlu1 %v737_v25, %s1918_s12 }
 0x513   :  { %v711_v3 = vmul.f32 %v1836_v27, %v709_v24  ;;  %vm717_vm13 = vweird.f32 %v1836_v27  ;;  %v1120_v24 = vld [vmem:[%s3105_s0 + $0x410] sm:$0xff] }
 0x514   :  { %vm718_vm15 = vmor %vm716_vm14, %vm717_vm13  ;;  %1144 = vmatpush.msra.mxu1 %v1120_v24 }
 0x515   :  { %v712_v28 = vmul.f32 %v1836_v27, %v711_v3  ;;  %v1119_v3 = vld [vmem:[%s3105_s0 + $0x408] sm:$0xff] }
 0x516   :  { %1145 = vmatpush.msra.mxu1 %v1119_v3 }
 0x517   :  { %v713_v29 = vmul.f32 0.5, %v712_v28 }
 0x519   :  { %v714_v30 = vsub.f32 1.5, %v713_v29  ;;  %v1118_v29 = vld [vmem:[%s3105_s0 + $0x400] sm:$0xff] }
 0x51a   :  { %1146 = vmatpush.msra.mxu1 %v1118_v29 }
 0x51b   :  { %v715_v31 = vmul.f32 %v1836_v27, %v714_v30 }
 0x51d   :  { %v719_v40 = vsel %vm718_vm15, %v1836_v27, %v715_v31 }
 0x51e   :  { %v720_v41 = vmul.f32 %v719_v40, %v2413_v26  ;;  %v40_v26 = vld [vmem:[%s3105_s0 + $0x5b0] sm:$0xff] }
 0x51f   :  { %907 = vmatpush.msrb.mxu3 %v40_v26  ;;  %945 = vmatpush.msra.mxu2 %v40_v26 }
 0x520   :  { %722 = vrot.lane.b32.xlu2 %v720_v41, %s1919_s13  ;;  %v755_v48 = vsel %vm754_vm0, %v720_v41, %v739_v47  ;;  %983 = vmatpush.msra.mxu0 %v40_v26  ;;  %v1117_v47 = vld [vmem:[%s3105_s0 + $0x3f8] sm:$0xff] }
 0x521   :  { %v2543_v49 = vsel %vm758_vm1, %v755_v48, %v737_v25  ;;  %908 = vmatpush.msrb.mxu3 %v39_v50  ;;  %946 = vmatpush.msra.mxu2 %v39_v50 }
 0x522   :  { %1761 = vmatmul.msk.f32.vlgmr.msrb.gmra.mxu2 %vm166_vm2, %v2543_v49  ;;  %1764 = vmatmul.msk.f32.vlgmr.msrb.gmra.mxu0 %vm166_vm2, %v2543_v49 }
 0x523   :  { %1767 = vmatmul.msk.f32.vlgmr.msrb.gmra.mxu1 %vm166_vm2, %v2543_v49  ;;  %984 = vmatpush.msra.mxu0 %v39_v50 }
 0x524   :  { %909 = vmatpush.msrb.mxu3 %v38_v32  ;;  %947 = vmatpush.msra.mxu2 %v38_v32 }
 0x525   :  { %985 = vmatpush.msra.mxu0 %v38_v32  ;;  %1147 = vmatpush.msra.mxu1 %v1117_v47 }
 0x526   :  { %910 = vmatpush.msrb.mxu3 %v37_v51  ;;  %948 = vmatpush.msra.mxu2 %v37_v51 }
 0x527   :  { %986 = vmatpush.msra.mxu0 %v37_v51  ;;  %v1116_v51 = vld [vmem:[%s3105_s0 + $0x3f0] sm:$0xff] }
 0x528   :  { %725 = vrot.lane.b32.xlu2 %v720_v41, %s1918_s12  ;;  %911 = vmatpush.msrb.mxu3 %v36_v52 }
 0x529   :  { %949 = vmatpush.msra.mxu2 %v36_v52  ;;  %987 = vmatpush.msra.mxu0 %v36_v52  ;;  %v1115_v52 = vld [vmem:[%s3105_s0 + $0x3e8] sm:$0xff] }
 0x52a   :  { %912 = vmatpush.msrb.mxu3 %v35_v53  ;;  %1148 = vmatpush.msra.mxu1 %v1116_v51 }
 0x52b   :  { %950 = vmatpush.msra.mxu2 %v35_v53  ;;  %988 = vmatpush.msra.mxu0 %v35_v53 }
 0x52c   :  { %913 = vmatpush.msrb.mxu3 %v34_v59  ;;  %1149 = vmatpush.msra.mxu1 %v1115_v52 }
 0x52d   :  { %951 = vmatpush.msra.mxu2 %v34_v59  ;;  %989 = vmatpush.msra.mxu0 %v34_v59 }
 0x52e   :  { %914 = vmatpush.msrb.mxu3 %v33_v60 }
 0x52f   :  { %952 = vmatpush.msra.mxu2 %v33_v60  ;;  %990 = vmatpush.msra.mxu0 %v33_v60 }
 0x530   :  { %915 = vmatpush.msrb.mxu3 %v32_v63 }
 0x531   :  { %953 = vmatpush.msra.mxu2 %v32_v63  ;;  %991 = vmatpush.msra.mxu0 %v32_v63 }
 0x532   :  { %916 = vmatpush.msrb.mxu3 %v31_v5 }
 0x533   :  { %954 = vmatpush.msra.mxu2 %v31_v5  ;;  %992 = vmatpush.msra.mxu0 %v31_v5 }
 0x534   :  { %917 = vmatpush.msrb.mxu3 %v30_v6 }
 0x535   :  { %955 = vmatpush.msra.mxu2 %v30_v6  ;;  %993 = vmatpush.msra.mxu0 %v30_v6 }
 0x536   :  { %918 = vmatpush.msrb.mxu3 %v29_v7 }
 0x537   :  { %956 = vmatpush.msra.mxu2 %v29_v7  ;;  %994 = vmatpush.msra.mxu0 %v29_v7 }
 0x538   :  { %1180 = vmatpush.msra.mxu3 %v2045_v33 }
 0x539   :  { %1224 = vmatpush.msrb.mxu2 %v2045_v33  ;;  %v1817_v33 = vld [vmem:[%s3107_s2 + $0x40] ss:$0 sm:$0xff] }
 0x53a   :  { %1181 = vmatpush.msra.mxu3 %v2050_v34 }
 0x53b   :  { %1225 = vmatpush.msrb.mxu2 %v2050_v34  ;;  %v1819_v34 = vld [vmem:[%s3107_s2 + $0x38] ss:$0 sm:$0xff] }
 0x53c   :  { %1182 = vmatpush.msra.mxu3 %v2058_v35 }
 0x53d   :  { %1226 = vmatpush.msrb.mxu2 %v2058_v35 }
 0x53e   :  { %1183 = vmatpush.msra.mxu3 %v2064_v36 }
 0x53f   :  { %1227 = vmatpush.msrb.mxu2 %v2064_v36 }
 0x540   :  { %1184 = vmatpush.msra.mxu3 %v2070_v37 }
 0x541   :  { %1228 = vmatpush.msrb.mxu2 %v2070_v37 }
 0x542   :  { %1185 = vmatpush.msra.mxu3 %v2076_v38 }
 0x543   :  { %1229 = vmatpush.msrb.mxu2 %v2076_v38 }
 0x544   :  { %1186 = vmatpush.msra.mxu3 %v2082_v39 }
 0x545   :  { %1230 = vmatpush.msrb.mxu2 %v2082_v39 }
 0x546   :  { %1187 = vmatpush.msra.mxu3 %v2091_v42 }
 0x547   :  { %1231 = vmatpush.msrb.mxu2 %v2091_v42 }
 0x548   :  { %1188 = vmatpush.msra.mxu3 %v2097_v43 }
 0x549   :  { %1232 = vmatpush.msrb.mxu2 %v2097_v43 }
 0x54a   :  { %1189 = vmatpush.msra.mxu3 %v2103_v44 }
 0x54b   :  { %1233 = vmatpush.msrb.mxu2 %v2103_v44 }
 0x54c   :  { %1190 = vmatpush.msra.mxu3 %v2109_v45 }
 0x54d   :  { %1234 = vmatpush.msrb.mxu2 %v2109_v45 }
 0x54e   :  { %1191 = vmatpush.msra.mxu3 %v2115_v46 }
 0x54f   :  { %1235 = vmatpush.msrb.mxu2 %v2115_v46 }
 0x574   :  { %v741_v54 = vpop.permute.xlu0 %740 }
 0x57a   :  { %v723_v55 = vpop.permute.xlu2 %722 }
 0x57b   :  { %v756_v56 = vsel %vm754_vm0, %v723_v55, %v741_v54  ;;  %v1114_v55 = vld [vmem:[%s3105_s0 + $0x3e0] sm:$0xff] }
 0x57c   :  { %v748_v57 = vpop.permute.xlu1 %747  ;;  %v743_v61 = vpop.permute.xlu0 %742  ;;  %1150 = vmatpush.msra.mxu1 %v1114_v55 }
 0x57d   :  { %v2572_v58 = vsel %vm758_vm1, %v756_v56, %v748_v57  ;;  %v1113_v57 = vld [vmem:[%s3105_s0 + $0x3d8] sm:$0xff] }
 0x57e   :  { %1762 = vmatmul.msk.f32.gmra.mxu2 %vm166_vm2, %v2572_v58  ;;  %1765 = vmatmul.msk.f32.gmra.mxu0 %vm166_vm2, %v2572_v58 }
 0x57f   :  { %1768 = vmatmul.msk.f32.gmra.mxu1 %vm166_vm2, %v2572_v58 }
 0x580   :  { %1151 = vmatpush.msra.mxu1 %v1113_v57 }
 0x582   :  { %v726_v62 = vpop.permute.xlu2 %725 }
 0x583   :  { %v757_v0 = vsel %vm754_vm0, %v726_v62, %v743_v61 }
 0x584   :  { %v750_v1 = vpop.permute.xlu1 %749 }
 0x585   :  { %v2591_v2 = vsel %vm758_vm1, %v757_v0, %v750_v1 }
 0x586   :  { %1763 = vmatmul.msk.f32.gmra.mxu2 %vm166_vm2, %v2591_v2  ;;  %1766 = vmatmul.msk.f32.gmra.mxu0 %vm166_vm2, %v2591_v2 }
 0x587   :  { %1769 = vmatmul.msk.f32.gmra.mxu1 %vm166_vm2, %v2591_v2 }
 0x59f   :  { %v842_v35 = vpop.f32.mrf.mxu0 }
 0x5a0   :  { %v843_v37 = vadd.f32 %v1817_v33, %v842_v35 }
 0x5a5   :  { %v802_v36 = vpop.f32.mrf.mxu2 }
 0x5a6   :  { %v803_v38 = vadd.f32 %v1819_v34, %v802_v36 }
 0x5a8   :  { %v891_v39 = vmul.f32 %v843_v37, %v803_v38 }
 0x5aa   :  { %1770 = vmatmul.msk.f32.vlgmr.msrb.gmra.mxu3 %vm166_vm2, %v891_v39 }
 0x5fb   :  { %v845_v42 = vpop.f32.mrf.mxu0 }
 0x5fc   :  { %v846_v43 = vadd.f32 %v1817_v33, %v845_v42 }
 0x5fe   :  { %v929_v44 = vmul.f32 %v846_v43, %v803_v38 }
 0x600   :  { %1773 = vmatmul.msk.f32.vlgmr.msra.gmra.mxu2 %vm166_vm2, %v929_v44 }
 0x601   :  { %v805_v45 = vpop.f32.mrf.mxu2 }
 0x602   :  { %v806_v8 = vadd.f32 %v1819_v34, %v805_v45 }
 0x603   :  { %v848_v9 = vpop.f32.mrf.mxu0 }
 0x604   :  { %v849_v10 = vadd.f32 %v1817_v33, %v848_v9  ;;  %v892_v11 = vmul.f32 %v843_v37, %v806_v8  ;;  %v930_v46 = vmul.f32 %v846_v43, %v806_v8 }
 0x606   :  { %v967_v12 = vmul.f32 %v849_v10, %v803_v38  ;;  %1771 = vmatmul.msk.f32.gmra.mxu3 %vm166_vm2, %v892_v11  ;;  %v968_v17 = vmul.f32 %v849_v10, %v806_v8 }
 0x608   :  { %1774 = vmatmul.msk.f32.gmra.mxu2 %vm166_vm2, %v930_v46  ;;  %1776 = vmatmul.msk.f32.vlgmr.msra.gmra.mxu0 %vm166_vm2, %v967_v12 }
 0x609   :  { %v808_v13 = vpop.f32.mrf.mxu2 }
 0x60a   :  { %v809_v14 = vadd.f32 %v1819_v34, %v808_v13 }
 0x60c   :  { %v893_v15 = vmul.f32 %v843_v37, %v809_v14  ;;  %v931_v16 = vmul.f32 %v846_v43, %v809_v14  ;;  %v969_v18 = vmul.f32 %v849_v10, %v809_v14  ;;  %v882_v37 = vpop.f32.mrf.mxu1 }
 0x60e   :  { %1772 = vmatmul.msk.f32.gmra.mxu3 %vm166_vm2, %v893_v15 }
 0x610   :  { %1775 = vmatmul.msk.f32.gmra.mxu2 %vm166_vm2, %v931_v16  ;;  %1777 = vmatmul.msk.f32.gmra.mxu0 %vm166_vm2, %v968_v17 }
 0x614   :  { %v885_v14 = vpop.f32.mrf.mxu1 }
 0x618   :  { %1778 = vmatmul.msk.f32.gmra.mxu0 %vm166_vm2, %v969_v18 }
 0x62d   :  { %v920_v21 = vpop.f32.mrf.mxu3 }
 0x683   :  { %v958_v23 = vpop.f32.mrf.mxu2 }
 0x684   :  { %v1005_v25 = vmax.f32 %v920_v21, %v958_v23 }
 0x685   :  { %v996_v27 = vpop.f32.mrf.mxu0 }
 0x686   :  { %v1008_v28 = vmax.f32 %v1005_v25, %v996_v27 }
 0x688   :  { %v1011_v30 = vsub.f32 %v920_v21, %v1008_v28  ;;  %v1020_v31 = vsub.f32 %v958_v23, %v1008_v28  ;;  %v1029_v40 = vsub.f32 %v996_v27, %v1008_v28 }
 0x689   :  { %v923_v41 = vpop.f32.mrf.mxu3 }
 0x68a   :  { %v1014_v48 = vmul.f32 1.442695, %v1011_v30  ;;  %v1023_v26 = vmul.f32 1.442695, %v1020_v31  ;;  %v1032_v50 = vmul.f32 1.442695, %v1029_v40  ;;  %v883_v31 = vadd.f32 %v1818_v22, %v882_v37 }
 0x68b   :  { %v961_v32 = vpop.f32.mrf.mxu2  ;;  %v886_v40 = vadd.f32 %v1818_v22, %v885_v14 }
 0x68c   :  { %1837 = vpow2.f32 %v1014_v48  ;;  %v1006_v53 = vmax.f32 %v923_v41, %v961_v32 }
 0x68d   :  { %1839 = vpow2.f32 %v1023_v26  ;;  %v999_v54 = vpop.f32.mrf.mxu0 }
 0x68e   :  { %v1009_v56 = vmax.f32 %v1006_v53, %v999_v54  ;;  %1841 = vpow2.f32 %v1032_v50 }
 0x690   :  { %v1012_v59 = vsub.f32 %v923_v41, %v1009_v56  ;;  %v1021_v60 = vsub.f32 %v961_v32, %v1009_v56  ;;  %v1030_v61 = vsub.f32 %v999_v54, %v1009_v56  ;;  %v888_v41 = vpop.f32.mrf.mxu1 }
 0x691   :  { %v926_v6 = vpop.f32.mrf.mxu3  ;;  %v889_v51 = vadd.f32 %v1818_v22, %v888_v41 }
 0x692   :  { %v1838_v62 = vpop.eup %1837  ;;  %v1016_v63 = vmul.f32 1.442695, %v1012_v59  ;;  %v1025_v0 = vmul.f32 1.442695, %v1021_v60  ;;  %v1034_v5 = vmul.f32 1.442695, %v1030_v61 }
 0x693   :  { %v1840_v1 = vpop.eup %1839  ;;  %v964_v7 = vpop.f32.mrf.mxu2 }
 0x694   :  { %v1038_v33 = vadd.f32 %v1840_v1, %v1838_v62  ;;  %1843 = vpow2.f32 %v1016_v63  ;;  %v1007_v34 = vmax.f32 %v926_v6, %v964_v7  ;;  %v1842_v35 = vpop.eup %1841 }
 0x695   :  { %1845 = vpow2.f32 %v1025_v0  ;;  %v1002_v36 = vpop.f32.mrf.mxu0 }
 0x696   :  { %v1041_v38 = vadd.f32 %v1842_v35, %v1038_v33  ;;  %v1010_v39 = vmax.f32 %v1007_v34, %v1002_v36  ;;  %1847 = vpow2.f32 %v1034_v5 }
 0x698   :  { %1849 = vrcp.f32 %v1041_v38  ;;  %v1013_v42 = vsub.f32 %v926_v6, %v1010_v39  ;;  %v1022_v43 = vsub.f32 %v964_v7, %v1010_v39  ;;  %v1031_v44 = vsub.f32 %v1002_v36, %v1010_v39 }
 0x699   :  { %v1055_v18 = vand.u32 2147483648, %v1041_v38  ;;  %v1053_v4 = vand.u32 2147483647, %v1041_v38  ;;  %vm1049_vm4 = vweird.f32 %v1041_v38 }
 0x69a   :  { %v2683_v45 = vpop.eup %1843  ;;  %v1018_v9 = vmul.f32 1.442695, %v1013_v42  ;;  %v1027_v10 = vmul.f32 1.442695, %v1022_v43  ;;  %v1036_v11 = vmul.f32 1.442695, %v1031_v44 }
 0x69b   :  { %v2685_v8 = vpop.eup %1845  ;;  %v1056_v3 = vor.u32 1.1754944e-38, %v1055_v18  ;;  %vm1054_vm6 = vcmp.eq.f32.partialorder %v1053_v4, 8.507059e+37  ;;  %v1820_v18 = vld [vmem:[%s3107_s2 + $0x50] ss:$0 sm:$0xff] }
 0x69c   :  { %v1039_v12 = vadd.f32 %v2685_v8, %v2683_v45  ;;  %v1848_v46 = vpop.eup %1847  ;;  %1851 = vpow2.f32 %v1018_v9 }
 0x69d   :  { %1853 = vpow2.f32 %v1027_v10 }
 0x69e   :  { %v1850_v13 = vpop.eup %1849  ;;  %v1042_v15 = vadd.f32 %v1848_v46, %v1039_v12  ;;  %1855 = vpow2.f32 %v1036_v11 }
 0x69f   :  { %v1045_v16 = vmul.f32 %v1850_v13, %v1041_v38  ;;  %vm1050_vm3 = vweird.f32 %v1850_v13 }
 0x6a0   :  { %1857 = vrcp.f32 %v1042_v15  ;;  %vm1051_vm5 = vmor %vm1049_vm4, %vm1050_vm3  ;;  %v1070_v54 = vand.u32 2147483648, %v1042_v15  ;;  %v1068_v56 = vand.u32 2147483647, %v1042_v15  ;;  %vm1064_vm8 = vweird.f32 %v1042_v15 }
 0x6a1   :  { %v1046_v17 = vsub.f32 1.0, %v1045_v16 }
 0x6a2   :  { %v2689_v19 = vpop.eup %1851  ;;  %v1071_v0 = vor.u32 1.1754944e-38, %v1070_v54  ;;  %vm1069_vm10 = vcmp.eq.f32.partialorder %v1068_v56, 8.507059e+37  ;;  %v1309_v54 = vld [vmem:[%s3106_s1 + $0x80] sm:$0xff]  ;;  %v1307_v56 = vld [vmem:[%s3106_s1 + $0x70] sm:$0xff] }
 0x6a3   :  { %v1047_v20 = vmul.f32 %v1850_v13, %v1046_v17  ;;  %v2691_v21 = vpop.eup %1853 }
 0x6a4   :  { %v2696_v23 = vpop.eup %1855  ;;  %v1040_v25 = vadd.f32 %v2691_v21, %v2689_v19 }
 0x6a5   :  { %v1048_v24 = vadd.f32 %v1850_v13, %v1047_v20 }
 0x6a6   :  { %v1858_v27 = vpop.eup %1857  ;;  %v1043_v29 = vadd.f32 %v2696_v23, %v1040_v25 }
 0x6a7   :  { %v1052_v28 = vsel %vm1051_vm5, %v1850_v13, %v1048_v24  ;;  %v1060_v30 = vmul.f32 %v1858_v27, %v1042_v15  ;;  %vm1065_vm7 = vweird.f32 %v1858_v27 }
 0x6a8   :  { %v1057_v47 = vsel %vm1054_vm6, %v1056_v3, %v1052_v28  ;;  %1859 = vrcp.f32 %v1043_v29  ;;  %vm1066_vm9 = vmor %vm1064_vm8, %vm1065_vm7  ;;  %v1085_v36 = vand.u32 2147483648, %v1043_v29  ;;  %vm1079_vm12 = vweird.f32 %v1043_v29 }
 0x6a9   :  { %v1089_v48 = vmul.f32 %v1838_v62, %v1057_v47  ;;  %v1095_v26 = vmul.f32 %v1840_v1, %v1057_v47  ;;  %v1104_v50 = vmul.f32 %v1842_v35, %v1057_v47  ;;  %v1061_v32 = vsub.f32 1.0, %v1060_v30 }
 0x6aa   :  { %v1083_v35 = vand.u32 2147483647, %v1043_v29  ;;  %v1086_v9 = vor.u32 1.1754944e-38, %v1085_v36  ;;  %v1294_v36 = vld [vmem:[%s3106_s1 + $0x8] sm:$0xff] }
 0x6ab   :  { %v1092_v52 = vmul.f32 %v1089_v48, %v883_v31  ;;  %v1098_v53 = vmul.f32 %v1095_v26, %v886_v40  ;;  %v1062_v55 = vmul.f32 %v1858_v27, %v1061_v32  ;;  %v1107_v57 = vmul.f32 %v1104_v50, %v889_v51  ;;  %v1315_v26 = vld [vmem:[%s3106_s1 + $0xb0] sm:$0xff]  ;;  %v1316_v50 = vld [vmem:[%s3106_s1 + $0xb8] sm:$0xff]  ;;  %v1313_v32 = vld [vmem:[%s3106_s1 + $0xa0] sm:$0xff] }
 0x6ac   :  { %vm1084_vm14 = vcmp.eq.f32.partialorder %v1083_v35, 8.507059e+37  ;;  %1337 = vmatpush.msrb.mxu0 %v1315_v26  ;;  %1363 = vmatpush.msrb.mxu1 %v1316_v50  ;;  %v1293_v35 = vld [vmem:[%s3106_s1] sm:$0xff]  ;;  %v1411_v26 = vld [vmem:[%s3105_s0 + $0x4d8] sm:$0xff] }
 0x6ad   :  { %v1101_v59 = vadd.f32 %v1098_v53, %v1092_v52  ;;  %v1063_v60 = vadd.f32 %v1858_v27, %v1062_v55  ;;  %v1311_v52 = vld [vmem:[%s3106_s1 + $0x90] sm:$0xff]  ;;  %v1312_v53 = vld [vmem:[%s3106_s1 + $0x98] sm:$0xff]  ;;  %v1310_v55 = vld [vmem:[%s3106_s1 + $0x88] sm:$0xff] }
 0x6ae   :  { %v1860_v61 = vpop.eup %1859  ;;  %1338 = vmatpush.msrb.mxu0 %v1313_v32  ;;  %v2922_v50 = vld [vmem:[%s3105_s0 + $0x5b8] sm:$0xff] }
 0x6af   :  { %v1110_v63 = vadd.f32 %v1107_v57, %v1101_v59  ;;  %v1067_v62 = vsel %vm1066_vm9, %v1858_v27, %v1063_v60  ;;  %v1075_v1 = vmul.f32 %v1860_v61, %v1043_v29  ;;  %vm1080_vm11 = vweird.f32 %v1860_v61  ;;  %v1308_v57 = vld [vmem:[%s3106_s1 + $0x78] sm:$0xff]  ;;  %v1305_v59 = vld [vmem:[%s3106_s1 + $0x60] sm:$0xff]  ;;  %v1306_v60 = vld [vmem:[%s3106_s1 + $0x68] sm:$0xff] }
 0x6b0   :  { %v1072_v5 = vsel %vm1069_vm10, %v1071_v0, %v1067_v62  ;;  %vm1081_vm13 = vmor %vm1079_vm12, %vm1080_vm11  ;;  %1339 = vmatpush.msrb.mxu0 %v1311_v52  ;;  %v1301_v0 = vld [vmem:[%s3106_s1 + $0x40] sm:$0xff]  ;;  %v1302_v62 = vld [vmem:[%s3106_s1 + $0x48] sm:$0xff] }
 0x6b1   :  { %1779 = vmatmul.msk.f32.vlgmr.msra.gmra.mxu1 %vm166_vm2, %v1110_v63  ;;  %v1090_v6 = vmul.f32 %v2683_v45, %v1072_v5  ;;  %v1096_v7 = vmul.f32 %v2685_v8, %v1072_v5  ;;  %v1105_v33 = vmul.f32 %v1848_v46, %v1072_v5  ;;  %v1076_v34 = vsub.f32 1.0, %v1075_v1  ;;  %v1304_v63 = vld [vmem:[%s3106_s1 + $0x58] sm:$0xff]  ;;  %v1299_v1 = vld [vmem:[%s3106_s1 + $0x30] sm:$0xff] }
 0x6b2   :  { %1340 = vmatpush.msrb.mxu0 %v1309_v54  ;;  %v1300_v5 = vld [vmem:[%s3106_s1 + $0x38] sm:$0xff]  ;;  %v1822_v54 = vld [vmem:[%s3107_s2 + $0x60] ss:$0 sm:$0xff] }
 0x6b3   :  { %v1093_v37 = vmul.f32 %v1090_v6, %v883_v31  ;;  %v1099_v38 = vmul.f32 %v1096_v7, %v886_v40  ;;  %v1077_v39 = vmul.f32 %v1860_v61, %v1076_v34  ;;  %v1108_v43 = vmul.f32 %v1105_v33, %v889_v51  ;;  %v1297_v6 = vld [vmem:[%s3106_s1 + $0x20] sm:$0xff]  ;;  %v1298_v7 = vld [vmem:[%s3106_s1 + $0x28] sm:$0xff]  ;;  %v1295_v33 = vld [vmem:[%s3106_s1 + $0x10] sm:$0xff] }
 0x6b4   :  { %1341 = vmatpush.msrb.mxu0 %v1307_v56  ;;  %v1296_v34 = vld [vmem:[%s3106_s1 + $0x18] sm:$0xff]  ;;  %v1400_v56 = vld [vmem:[%s3105_s0 + $0x480] sm:$0xff] }
 0x6b5   :  { %v1102_v42 = vadd.f32 %v1099_v38, %v1093_v37  ;;  %v1078_v44 = vadd.f32 %v1860_v61, %v1077_v39  ;;  %v2808_v37 = vld [vmem:[%s3105_s0 + $0x610] sm:$0xff] }
 0x6b6   :  { %1342 = vmatpush.msrb.mxu0 %v1305_v59 }
 0x6b7   :  { %v1111_v10 = vadd.f32 %v1108_v43, %v1102_v42  ;;  %v1082_v11 = vsel %vm1081_vm13, %v1860_v61, %v1078_v44  ;;  %v1303_v61 = vld [vmem:[%s3106_s1 + $0x50] sm:$0xff]  ;;  %v2815_v42 = vld [vmem:[%s3105_s0 + $0x608] sm:$0xff]  ;;  %v2822_v44 = vld [vmem:[%s3105_s0 + $0x600] sm:$0xff] }
 0x6b8   :  { %v1087_v45 = vsel %vm1084_vm14, %v1086_v9, %v1082_v11  ;;  %1343 = vmatpush.msrb.mxu0 %v1303_v61  ;;  %v2829_v9 = vld [vmem:[%s3105_s0 + $0x5f8] sm:$0xff] }
 0x6b9   :  { %1780 = vmatmul.msk.f32.gmra.mxu1 %vm166_vm2, %v1111_v10  ;;  %v1091_v8 = vmul.f32 %v2689_v19, %v1087_v45  ;;  %v1097_v12 = vmul.f32 %v2691_v21, %v1087_v45  ;;  %v1106_v46 = vmul.f32 %v2696_v23, %v1087_v45  ;;  %v2836_v10 = vld [vmem:[%s3105_s0 + $0x5f0] sm:$0xff]  ;;  %v2843_v45 = vld [vmem:[%s3105_s0 + $0x5e8] sm:$0xff]  ;;  %v1399_v61 = vld [vmem:[%s3105_s0 + $0x478] sm:$0xff] }
 0x6ba   :  { %1344 = vmatpush.msrb.mxu0 %v1301_v0 }
 0x6bb   :  { %v1094_v13 = vmul.f32 %v1091_v8, %v883_v31  ;;  %v1100_v14 = vmul.f32 %v1097_v12, %v886_v40  ;;  %v1109_v16 = vmul.f32 %v1106_v46, %v889_v51  ;;  %v1314_v51 = vld [vmem:[%s3106_s1 + $0xa8] sm:$0xff]  ;;  %v2850_v46 = vld [vmem:[%s3105_s0 + $0x5e0] sm:$0xff] }
 0x6bc   :  { %1364 = vmatpush.msrb.mxu1 %v1314_v51  ;;  %1345 = vmatpush.msrb.mxu0 %v1299_v1  ;;  %v1401_v51 = vld [vmem:[%s3105_s0 + $0x488] sm:$0xff]  ;;  %v1398_v1 = vld [vmem:[%s3105_s0 + $0x470] sm:$0xff] }
 0x6bd   :  { %v1103_v15 = vadd.f32 %v1100_v14, %v1094_v13 }
 0x6be   :  { %1365 = vmatpush.msrb.mxu1 %v1312_v53  ;;  %1346 = vmatpush.msrb.mxu0 %v1297_v6 }
 0x6bf   :  { %v1112_v17 = vadd.f32 %v1109_v16, %v1103_v15  ;;  %v2859_v15 = vld [vmem:[%s3105_s0 + $0x5d8] sm:$0xff] }
 0x6c0   :  { %1366 = vmatpush.msrb.mxu1 %v1310_v55  ;;  %1347 = vmatpush.msrb.mxu0 %v1295_v33  ;;  %v1410_v55 = vld [vmem:[%s3105_s0 + $0x4d0] sm:$0xff] }
 0x6c1   :  { %1781 = vmatmul.msk.f32.gmra.mxu1 %vm166_vm2, %v1112_v17  ;;  %v1406_v17 = vld [vmem:[%s3105_s0 + $0x4b0] sm:$0xff] }
 0x6c2   :  { %1367 = vmatpush.msrb.mxu1 %v1308_v57  ;;  %1348 = vmatpush.msrb.mxu0 %v1293_v35  ;;  %v1396_v35 = vld [vmem:[%s3105_s0 + $0x460] sm:$0xff] }
 0x6c3   :  { %1426 = vmatpush.msrb.mxu3 %v1406_v17 }
 0x6c4   :  { %1368 = vmatpush.msrb.mxu1 %v1306_v60  ;;  %1496 = vmatpush.msra.mxu0 %v2808_v37 }
 0x6c6   :  { %1369 = vmatpush.msrb.mxu1 %v1304_v63  ;;  %1497 = vmatpush.msra.mxu0 %v2815_v42 }
 0x6c8   :  { %1370 = vmatpush.msrb.mxu1 %v1302_v62  ;;  %1498 = vmatpush.msra.mxu0 %v2822_v44 }
 0x6ca   :  { %1371 = vmatpush.msrb.mxu1 %v1300_v5  ;;  %1499 = vmatpush.msra.mxu0 %v2829_v9 }
 0x6cc   :  { %1372 = vmatpush.msrb.mxu1 %v1298_v7  ;;  %1500 = vmatpush.msra.mxu0 %v2836_v10  ;;  %v1397_v7 = vld [vmem:[%s3105_s0 + $0x468] sm:$0xff] }
 0x6ce   :  { %1373 = vmatpush.msrb.mxu1 %v1296_v34  ;;  %1501 = vmatpush.msra.mxu0 %v2843_v45 }
 0x6d0   :  { %1374 = vmatpush.msrb.mxu1 %v1294_v36  ;;  %1502 = vmatpush.msra.mxu0 %v2850_v46 }
 0x6d2   :  { %1540 = vmatpush.msra.mxu1 %v2808_v37  ;;  %1503 = vmatpush.msra.mxu0 %v2859_v15 }
 0x6d4   :  { %1541 = vmatpush.msra.mxu1 %v2815_v42 }
 0x6d6   :  { %1542 = vmatpush.msra.mxu1 %v2822_v44 }
 0x6d8   :  { %1543 = vmatpush.msra.mxu1 %v2829_v9 }
 0x6da   :  { %1544 = vmatpush.msra.mxu1 %v2836_v10 }
 0x6dc   :  { %1545 = vmatpush.msra.mxu1 %v2843_v45 }
 0x6de   :  { %1546 = vmatpush.msra.mxu1 %v2850_v46 }
 0x6e0   :  { %1547 = vmatpush.msra.mxu1 %v2859_v15 }
 0x72e   :  { %v1153_v20 = vpop.f32.mrf.mxu1 }
 0x72f   :  { %v1154_v4 = vadd.f32 %v1820_v18, %v1153_v20  ;;  %v2873_v20 = vld [vmem:[%s3105_s0 + $0x5d0] sm:$0xff] }
 0x730   :  { %1504 = vmatpush.msra.mxu0 %v2873_v20  ;;  %1548 = vmatpush.msra.mxu1 %v2873_v20 }
 0x731   :  { %v1162_v22 = vadd.f32 %v1154_v4, %v2543_v49 }
 0x733   :  { %1782 = vmatmul.msk.f32.vlgmr.msra.gmra.mxu3 %vm166_vm2, %v1162_v22 }
 0x736   :  { %v1156_v19 = vpop.f32.mrf.mxu1 }
 0x737   :  { %v1157_v21 = vadd.f32 %v1820_v18, %v1156_v19 }
 0x739   :  { %v1163_v23 = vadd.f32 %v1157_v21, %v2572_v58  ;;  %v1414_v21 = vld [vmem:[%s3105_s0 + $0x4f0] sm:$0xff] }
 0x73a   :  { %1460 = vmatpush.msra.mxu2 %v1414_v21 }
 0x73b   :  { %1783 = vmatmul.msk.f32.gmra.mxu3 %vm166_vm2, %v1163_v23 }
 0x73e   :  { %v1159_v24 = vpop.f32.mrf.mxu1 }
 0x73f   :  { %v1160_v25 = vadd.f32 %v1820_v18, %v1159_v24  ;;  %v1405_v18 = vld [vmem:[%s3105_s0 + $0x4a8] sm:$0xff] }
 0x740   :  { %1427 = vmatpush.msrb.mxu3 %v1405_v18  ;;  %v2889_v24 = vld [vmem:[%s3105_s0 + $0x5c8] sm:$0xff] }
 0x741   :  { %v1164_v27 = vadd.f32 %v1160_v25, %v2591_v2  ;;  %1505 = vmatpush.msra.mxu0 %v2889_v24  ;;  %1549 = vmatpush.msra.mxu1 %v2889_v24 }
 0x743   :  { %1784 = vmatmul.msk.f32.gmra.mxu3 %vm166_vm2, %v1164_v27 }
 0x7b6   :  { %v1193_v3 = vpop.f32.mrf.mxu3 }
 0x7b7   :  { %v1202_v28 = vmul.f32 0.03125, %v1193_v3  ;;  %v1403_v3 = vld [vmem:[%s3105_s0 + $0x498] sm:$0xff] }
 0x7b9   :  { %v2718_v29 = vsub.f32 %v1162_v22, %v1202_v28  ;;  %v1404_v22 = vld [vmem:[%s3105_s0 + $0x4a0] sm:$0xff] }
 0x7ba   :  { %1428 = vmatpush.msrb.mxu3 %v1404_v22  ;;  %v1412_v28 = vld [vmem:[%s3105_s0 + $0x4e0] sm:$0xff] }
 0x7bb   :  { %v1208_v49 = vmul.f32 %v2718_v29, %v2718_v29 }
 0x7bc   :  { %1429 = vmatpush.msrb.mxu3 %v1403_v3 }
 0x7bd   :  { %1785 = vmatmul.msk.f32.vlgmr.msrb.gmra.mxu2 %vm166_vm2, %v1208_v49  ;;  %v2902_v49 = vld [vmem:[%s3105_s0 + $0x5c0] sm:$0xff] }
 0x7be   :  { %v1196_v30 = vpop.f32.mrf.mxu3  ;;  %1506 = vmatpush.msra.mxu0 %v2902_v49  ;;  %1550 = vmatpush.msra.mxu1 %v2902_v49 }
 0x7bf   :  { %v1203_v31 = vmul.f32 0.03125, %v1196_v30 }
 0x7c0   :  { %1507 = vmatpush.msra.mxu0 %v2922_v50  ;;  %1551 = vmatpush.msra.mxu1 %v2922_v50 }
 0x7c1   :  { %v2723_v58 = vsub.f32 %v1163_v23, %v1203_v31  ;;  %v1413_v23 = vld [vmem:[%s3105_s0 + $0x4e8] sm:$0xff] }
 0x7c2   :  { %1461 = vmatpush.msra.mxu2 %v1413_v23 }
 0x7c3   :  { %v1209_v40 = vmul.f32 %v2723_v58, %v2723_v58 }
 0x7c4   :  { %1462 = vmatpush.msra.mxu2 %v1412_v28 }
 0x7c5   :  { %1786 = vmatmul.msk.f32.gmra.mxu2 %vm166_vm2, %v1209_v40 }
 0x7c6   :  { %v1199_v2 = vpop.f32.mrf.mxu3  ;;  %1463 = vmatpush.msra.mxu2 %v1411_v26 }
 0x7c7   :  { %v1204_v41 = vmul.f32 0.03125, %v1199_v2  ;;  %v1402_v2 = vld [vmem:[%s3105_s0 + $0x490] sm:$0xff] }
 0x7c8   :  { %1430 = vmatpush.msrb.mxu3 %v1402_v2  ;;  %1464 = vmatpush.msra.mxu2 %v1410_v55  ;;  %v1823_v2 = vld [vmem:[%s3107_s2 + $0x68] ss:$0 sm:$0xff] }
 0x7c9   :  { %v2728_v47 = vsub.f32 %v1164_v27, %v1204_v41  ;;  %v2913_v41 = vld [vmem:[%s3107_s2 + $0x58] ss:$0 sm:$0xff] }
 0x7ca   :  { %1431 = vmatpush.msrb.mxu3 %v1401_v51 }
 0x7cb   :  { %v1210_v48 = vmul.f32 %v2728_v47, %v2728_v47 }
 0x7cc   :  { %1432 = vmatpush.msrb.mxu3 %v1400_v56 }
 0x7cd   :  { %1787 = vmatmul.msk.f32.gmra.mxu2 %vm166_vm2, %v1210_v48 }
 0x7ce   :  { %1433 = vmatpush.msrb.mxu3 %v1399_v61 }
 0x7d0   :  { %1434 = vmatpush.msrb.mxu3 %v1398_v1 }
 0x7d2   :  { %1435 = vmatpush.msrb.mxu3 %v1397_v7 }
 0x7d4   :  { %1436 = vmatpush.msrb.mxu3 %v1396_v35 }
 0x840   :  { %v1237_v38 = vpop.f32.mrf.mxu2 }
 0x841   :  { %v1246_v39 = vmul.f32 0.03125, %v1237_v38 }
 0x843   :  { %v1249_v43 = vadd.f32 1e-05, %v1246_v39 }
 0x845   :  { %1861 = vrsqrt.f32 %v1249_v43  ;;  %vm1258_vm3 = vweird.f32 %v1249_v43 }
 0x848   :  { %v1240_v11 = vpop.f32.mrf.mxu2 }
 0x849   :  { %v1247_v8 = vmul.f32 0.03125, %v1240_v11 }
 0x84b   :  { %v1862_v12 = vpop.eup %1861  ;;  %v2854_v14 = vadd.f32 1e-05, %v1247_v8  ;;  %v1408_v8 = vld [vmem:[%s3105_s0 + $0x4c0] sm:$0xff] }
 0x84c   :  { %v1253_v13 = vmul.f32 %v1862_v12, %v1249_v43  ;;  %vm1259_vm15 = vweird.f32 %v1862_v12 }
 0x84d   :  { %1863 = vrsqrt.f32 %v2854_v14  ;;  %vm1260_vm4 = vmor %vm1258_vm3, %vm1259_vm15  ;;  %vm1268_vm6 = vweird.f32 %v2854_v14 }
 0x84e   :  { %v1254_v16 = vmul.f32 %v1862_v12, %v1253_v13  ;;  %v1788_v13 = vld [vmem:[%s3106_s1 + $0xc0] ss:$8 sm:$0x3] }
 0x850   :  { %v1255_v4 = vmul.f32 0.5, %v1254_v16  ;;  %v1243_v19 = vpop.f32.mrf.mxu2 }
 0x851   :  { %v1248_v27 = vmul.f32 0.03125, %v1243_v19 }
 0x852   :  { %v1256_v25 = vsub.f32 1.5, %v1255_v4 }
 0x853   :  { %v1864_v30 = vpop.eup %1863  ;;  %v1251_v40 = vadd.f32 1e-05, %v1248_v27 }
 0x854   :  { %v1257_v31 = vmul.f32 %v1862_v12, %v1256_v25  ;;  %v1263_v48 = vmul.f32 %v1864_v30, %v2854_v14  ;;  %vm1269_vm5 = vweird.f32 %v1864_v30  ;;  %v1320_v14 = vperm.slane %v1788_v13, 0 }
 0x855   :  { %1865 = vrsqrt.f32 %v1251_v40  ;;  %vm1270_vm7 = vmor %vm1268_vm6, %vm1269_vm5  ;;  %vm1278_vm9 = vweird.f32 %v1251_v40 }
 0x856   :  { %v1261_v32 = vsel %vm1260_vm4, %v1862_v12, %v1257_v31  ;;  %v1264_v53 = vmul.f32 %v1864_v30, %v1263_v48  ;;  %v1391_v12 = vld [vmem:[%s3105_s0 + $0x438] sm:$0xff] }
 0x857   :  { %v1282_v52 = vmul.f32 %v1261_v32, %v2718_v29 }
 0x858   :  { %v1265_v59 = vmul.f32 0.5, %v1264_v53 }
 0x859   :  { %v1286_v57 = vmul.f32 %v2913_v41, %v1282_v52 }
 0x85a   :  { %v1266_v29 = vsub.f32 1.5, %v1265_v59 }
 0x85b   :  { %v2940_v60 = vadd.f32 %v1822_v54, %v1286_v57  ;;  %v1866_v63 = vpop.eup %1865 }
 0x85c   :  { %v1267_v0 = vmul.f32 %v1864_v30, %v1266_v29  ;;  %v1273_v62 = vmul.f32 %v1866_v63, %v1251_v40  ;;  %vm1279_vm8 = vweird.f32 %v1866_v63 }
 0x85d   :  { %1789 = vmatmul.msk.f32.vlgmr.msrb.gmra.mxu0 %vm166_vm2, %v2940_v60  ;;  %1792 = vmatmul.msk.f32.vlgmr.msrb.gmra.mxu1 %vm166_vm2, %v2940_v60  ;;  %vm1280_vm10 = vmor %vm1278_vm9, %vm1279_vm8 }
 0x85e   :  { %1662 = vmatpush.msrb.mxu0 %v2808_v37  ;;  %v1271_v5 = vsel %vm1270_vm7, %v1864_v30, %v1267_v0  ;;  %v1274_v6 = vmul.f32 %v1866_v63, %v1273_v62 }
 0x85f   :  { %v1283_v33 = vmul.f32 %v1271_v5, %v2723_v58  ;;  %v1395_v58 = vld [vmem:[%s3105_s0 + $0x458] sm:$0xff] }
 0x860   :  { %1663 = vmatpush.msrb.mxu0 %v2815_v42  ;;  %v1275_v34 = vmul.f32 0.5, %v1274_v6  ;;  %v1394_v42 = vld [vmem:[%s3105_s0 + $0x450] sm:$0xff]  ;;  %1437 = vmatpush.msrb.mxu3 %v1395_v58  ;;  %v1621_v58 = vld [vmem:[%s3105_s0 + $0x540] sm:$0xff] }
 0x861   :  { %v1287_v36 = vmul.f32 %v2913_v41, %v1283_v33 }
 0x862   :  { %1664 = vmatpush.msrb.mxu0 %v2822_v44  ;;  %v1276_v37 = vsub.f32 1.5, %v1275_v34  ;;  %1438 = vmatpush.msrb.mxu3 %v1394_v42 }
 0x863   :  { %v2964_v38 = vadd.f32 %v1822_v54, %v1287_v36 }
 0x864   :  { %1665 = vmatpush.msrb.mxu0 %v2829_v9  ;;  %v1277_v39 = vmul.f32 %v1866_v63, %v1276_v37  ;;  %v1623_v37 = vld [vmem:[%s3105_s0 + $0x550] sm:$0xff] }
 0x865   :  { %1790 = vmatmul.msk.f32.gmra.mxu0 %vm166_vm2, %v2964_v38  ;;  %1793 = vmatmul.msk.f32.gmra.mxu1 %vm166_vm2, %v2964_v38 }
 0x866   :  { %v1281_v43 = vsel %vm1280_vm10, %v1866_v63, %v1277_v39  ;;  %1666 = vmatpush.msrb.mxu0 %v2836_v10  ;;  %v1409_v10 = vld [vmem:[%s3105_s0 + $0x4c8] sm:$0xff] }
 0x867   :  { %v1284_v44 = vmul.f32 %v1281_v43, %v2728_v47  ;;  %v1393_v47 = vld [vmem:[%s3105_s0 + $0x448] sm:$0xff]  ;;  %1465 = vmatpush.msra.mxu2 %v1409_v10  ;;  %v1620_v43 = vld [vmem:[%s3105_s0 + $0x538] sm:$0xff] }
 0x868   :  { %1667 = vmatpush.msrb.mxu0 %v2843_v45  ;;  %1439 = vmatpush.msrb.mxu3 %v1393_v47  ;;  %v1392_v45 = vld [vmem:[%s3105_s0 + $0x440] sm:$0xff] }
 0x869   :  { %v1288_v9 = vmul.f32 %v2913_v41, %v1284_v44  ;;  %1466 = vmatpush.msra.mxu2 %v1408_v8  ;;  %v1617_v47 = vld [vmem:[%s3105_s0 + $0x520] sm:$0xff] }
 0x86a   :  { %1668 = vmatpush.msrb.mxu0 %v2850_v46  ;;  %1440 = vmatpush.msrb.mxu3 %v1392_v45  ;;  %v1407_v46 = vld [vmem:[%s3105_s0 + $0x4b8] sm:$0xff] }
 0x86b   :  { %v2982_v11 = vadd.f32 %v1822_v54, %v1288_v9  ;;  %1467 = vmatpush.msra.mxu2 %v1407_v46  ;;  %v1619_v9 = vld [vmem:[%s3105_s0 + $0x530] sm:$0xff]  ;;  %v1616_v45 = vld [vmem:[%s3105_s0 + $0x518] sm:$0xff] }
 0x86c   :  { %1669 = vmatpush.msrb.mxu0 %v2859_v15  ;;  %1441 = vmatpush.msrb.mxu3 %v1391_v12  ;;  %v1321_v15 = vperm.slane %v1788_v13, 1  ;;  %v1615_v46 = vld [vmem:[%s3105_s0 + $0x510] sm:$0xff] }
 0x86d   :  { %1791 = vmatmul.msk.f32.gmra.mxu0 %vm166_vm2, %v2982_v11  ;;  %1794 = vmatmul.msk.f32.gmra.mxu1 %vm166_vm2, %v2982_v11 }
 0x86e   :  { %1670 = vmatpush.msrb.mxu0 %v2873_v20  ;;  %1633 = vmatpush.msrb.mxu2 %v1623_v37 }
 0x870   :  { %1671 = vmatpush.msrb.mxu0 %v2889_v24 }
 0x872   :  { %1672 = vmatpush.msrb.mxu0 %v2902_v49 }
 0x874   :  { %1673 = vmatpush.msrb.mxu0 %v2922_v50 }
 0x8da   :  { %v1350_v16 = vpop.f32.mrf.mxu0  ;;  %v1376_v17 = vpop.f32.mrf.mxu1 }
 0x8db   :  { %v1351_v18 = vadd.f32 %v1350_v16, %v1320_v14  ;;  %v1377_v20 = vadd.f32 %v1376_v17, %v1321_v15  ;;  %v1613_v16 = vld [vmem:[%s3105_s0 + $0x500] sm:$0xff] }
 0x8dd   :  { %v1385_v4 = vmax.f32 %v1351_v18, 0.0  ;;  %v1386_v22 = vmax.f32 %v1377_v20, 0.0  ;;  %v1612_v18 = vld [vmem:[%s3105_s0 + $0x4f8] sm:$0xff] }
 0x8df   :  { %1442 = vmatmul.f32.vlgmr.msrb.gmra.mxu3 %v1385_v4  ;;  %1795 = vmatmul.msk.f32.vlgmr.msra.gmra.mxu2 %vm758_vm1, %v1386_v22 }
 0x8e2   :  { %v1353_v19 = vpop.f32.mrf.mxu0  ;;  %v1379_v21 = vpop.f32.mrf.mxu1 }
 0x8e3   :  { %v1354_v23 = vadd.f32 %v1353_v19, %v1320_v14  ;;  %v1380_v24 = vadd.f32 %v1379_v21, %v1321_v15 }
 0x8e5   :  { %v1387_v25 = vmax.f32 %v1354_v23, 0.0  ;;  %v1388_v27 = vmax.f32 %v1380_v24, 0.0 }
 0x8e7   :  { %1445 = vmatmul.f32.gmra.mxu3 %v1387_v25  ;;  %1796 = vmatmul.msk.f32.gmra.mxu2 %vm758_vm1, %v1388_v27 }
 0x8ea   :  { %v1356_v3 = vpop.f32.mrf.mxu0  ;;  %v1382_v28 = vpop.f32.mrf.mxu1 }
 0x8eb   :  { %v1357_v49 = vadd.f32 %v1356_v3, %v1320_v14  ;;  %v1383_v30 = vadd.f32 %v1382_v28, %v1321_v15  ;;  %v1614_v15 = vld [vmem:[%s3105_s0 + $0x508] sm:$0xff] }
 0x8ed   :  { %v1389_v31 = vmax.f32 %v1357_v49, 0.0  ;;  %v1390_v40 = vmax.f32 %v1383_v30, 0.0 }
 0x8ef   :  { %1448 = vmatmul.f32.gmra.mxu3 %v1389_v31  ;;  %1797 = vmatmul.msk.f32.gmra.mxu2 %vm758_vm1, %v1390_v40 }
 0x962   :  { %v1443_v41 = vpop.f32.mrf.mxu3  ;;  %v1469_v48 = vpop.f32.mrf.mxu2 }
 0x963   :  { %v1444_v26 = vadd.f32 %v1823_v2, %v1443_v41 }
 0x965   :  { %v1470_v50 = vadd.f32 %v1469_v48, %v1444_v26 }
 0x967   :  { %v1478_v32 = vadd.f32 %v1470_v50, %v2940_v60 }
 0x969   :  { %1798 = vmatmul.msk.f32.vlgmr.msra.gmra.mxu0 %vm166_vm2, %v1478_v32 }
 0x96a   :  { %v1446_v51 = vpop.f32.mrf.mxu3  ;;  %v1472_v52 = vpop.f32.mrf.mxu2 }
 0x96b   :  { %v1447_v53 = vadd.f32 %v1823_v2, %v1446_v51 }
 0x96d   :  { %v1473_v54 = vadd.f32 %v1472_v52, %v1447_v53 }
 0x96f   :  { %v1479_v55 = vadd.f32 %v1473_v54, %v2964_v38  ;;  %v1622_v38 = vld [vmem:[%s3105_s0 + $0x548] sm:$0xff] }
 0x970   :  { %1634 = vmatpush.msrb.mxu2 %v1622_v38 }
 0x971   :  { %1799 = vmatmul.msk.f32.gmra.mxu0 %vm166_vm2, %v1479_v55 }
 0x972   :  { %v1449_v56 = vpop.f32.mrf.mxu3  ;;  %v1475_v59 = vpop.f32.mrf.mxu2  ;;  %1635 = vmatpush.msrb.mxu2 %v1621_v58 }
 0x973   :  { %v1450_v57 = vadd.f32 %v1823_v2, %v1449_v56 }
 0x974   :  { %1636 = vmatpush.msrb.mxu2 %v1620_v43 }
 0x975   :  { %v1476_v29 = vadd.f32 %v1475_v59, %v1450_v57 }
 0x976   :  { %1637 = vmatpush.msrb.mxu2 %v1619_v9 }
 0x977   :  { %v1480_v61 = vadd.f32 %v1476_v29, %v2982_v11  ;;  %v1618_v11 = vld [vmem:[%s3105_s0 + $0x528] sm:$0xff] }
 0x978   :  { %1638 = vmatpush.msrb.mxu2 %v1618_v11 }
 0x979   :  { %1800 = vmatmul.msk.f32.gmra.mxu0 %vm166_vm2, %v1480_v61 }
 0x97a   :  { %1639 = vmatpush.msrb.mxu2 %v1617_v47 }
 0x97c   :  { %1640 = vmatpush.msrb.mxu2 %v1616_v45 }
 0x97e   :  { %1641 = vmatpush.msrb.mxu2 %v1615_v46 }
 0x980   :  { %1642 = vmatpush.msrb.mxu2 %v1614_v15 }
 0x982   :  { %1643 = vmatpush.msrb.mxu2 %v1613_v16 }
 0x984   :  { %1644 = vmatpush.msrb.mxu2 %v1612_v18 }
 0x9e6   :  { %v1509_v63 = vpop.f32.mrf.mxu0 }
 0x9e7   :  { %v1518_v60 = vmul.f32 0.03125, %v1509_v63 }
 0x9e9   :  { %v3026_v0 = vsub.f32 %v1478_v32, %v1518_v60  ;;  %v1824_v32 = vld [vmem:[%s3107_s2 + $0x70] ss:$0 sm:$0xff] }
 0x9eb   :  { %v1524_v62 = vmul.f32 %v3026_v0, %v3026_v0 }
 0x9ed   :  { %1801 = vmatmul.msk.f32.vlgmr.msra.gmra.mxu1 %vm166_vm2, %v1524_v62 }
 0x9ee   :  { %v1512_v1 = vpop.f32.mrf.mxu0 }
 0x9ef   :  { %v1519_v5 = vmul.f32 0.03125, %v1512_v1  ;;  %v1826_v1 = vld [vmem:[%s3107_s2 + $0x80] ss:$0 sm:$0xff] }
 0x9f1   :  { %v3031_v6 = vsub.f32 %v1479_v55, %v1519_v5  ;;  %v1825_v55 = vld [vmem:[%s3107_s2 + $0x78] ss:$0 sm:$0xff] }
 0x9f3   :  { %v1525_v7 = vmul.f32 %v3031_v6, %v3031_v6 }
 0x9f5   :  { %1802 = vmatmul.msk.f32.gmra.mxu1 %vm166_vm2, %v1525_v7  ;;  %v1827_v7 = vld [vmem:[%s3107_s2 + $0x88] ss:$0 sm:$0xff] }
 0x9f6   :  { %v1515_v33 = vpop.f32.mrf.mxu0 }
 0x9f7   :  { %v1520_v34 = vmul.f32 0.03125, %v1515_v33 }
 0x9f9   :  { %v3036_v35 = vsub.f32 %v1480_v61, %v1520_v34 }
 0x9fb   :  { %v1526_v36 = vmul.f32 %v3036_v35, %v3036_v35 }
 0x9fd   :  { %1803 = vmatmul.msk.f32.gmra.mxu1 %vm166_vm2, %v1526_v36 }
 0xa6a   :  { %v1553_v39 = vpop.f32.mrf.mxu1 }
 0xa6b   :  { %v1562_v42 = vmul.f32 0.03125, %v1553_v39 }
 0xa6d   :  { %v1565_v44 = vadd.f32 1e-05, %v1562_v42 }
 0xa6f   :  { %1867 = vrsqrt.f32 %v1565_v44  ;;  %vm1574_vm12 = vweird.f32 %v1565_v44 }
 0xa72   :  { %v1556_v10 = vpop.f32.mrf.mxu1 }
 0xa73   :  { %v1563_v8 = vmul.f32 0.03125, %v1556_v10 }
 0xa75   :  { %v1868_v12 = vpop.eup %1867  ;;  %v1566_v14 = vadd.f32 1e-05, %v1563_v8 }
 0xa76   :  { %v1569_v13 = vmul.f32 %v1868_v12, %v1565_v44  ;;  %vm1575_vm1 = vweird.f32 %v1868_v12 }
 0xa77   :  { %1869 = vrsqrt.f32 %v1566_v14  ;;  %vm1576_vm13 = vmor %vm1574_vm12, %vm1575_vm1  ;;  %vm1584_vm14 = vweird.f32 %v1566_v14 }
 0xa78   :  { %v1570_v17 = vmul.f32 %v1868_v12, %v1569_v13 }
 0xa7a   :  { %v1559_v20 = vpop.f32.mrf.mxu1  ;;  %v1571_v22 = vmul.f32 0.5, %v1570_v17 }
 0xa7b   :  { %v1564_v4 = vmul.f32 0.03125, %v1559_v20 }
 0xa7c   :  { %v1572_v24 = vsub.f32 1.5, %v1571_v22 }
 0xa7d   :  { %v1870_v19 = vpop.eup %1869  ;;  %v1567_v21 = vadd.f32 1e-05, %v1564_v4 }
 0xa7e   :  { %v1579_v23 = vmul.f32 %v1870_v19, %v1566_v14  ;;  %v1573_v3 = vmul.f32 %v1868_v12, %v1572_v24  ;;  %vm1585_vm11 = vweird.f32 %v1870_v19 }
 0xa7f   :  { %1871 = vrsqrt.f32 %v1567_v21  ;;  %vm1586_vm15 = vmor %vm1584_vm14, %vm1585_vm11  ;;  %vm1594_vm4 = vweird.f32 %v1567_v21 }
 0xa80   :  { %v1580_v25 = vmul.f32 %v1870_v19, %v1579_v23  ;;  %v1577_v40 = vsel %vm1576_vm13, %v1868_v12, %v1573_v3 }
 0xa81   :  { %v1598_v50 = vmul.f32 %v1577_v40, %v3026_v0 }
 0xa82   :  { %v1581_v27 = vmul.f32 0.5, %v1580_v25 }
 0xa83   :  { %v1602_v54 = vmul.f32 %v1824_v32, %v1598_v50 }
 0xa84   :  { %v1582_v28 = vsub.f32 1.5, %v1581_v27 }
 0xa85   :  { %v1872_v49 = vpop.eup %1871  ;;  %v1606_v29 = vadd.f32 %v1825_v55, %v1602_v54 }
 0xa86   :  { %v1583_v30 = vmul.f32 %v1870_v19, %v1582_v28  ;;  %v1589_v31 = vmul.f32 %v1872_v49, %v1567_v21  ;;  %vm1595_vm3 = vweird.f32 %v1872_v49 }
 0xa87   :  { %vm1596_vm5 = vmor %vm1594_vm4, %vm1595_vm3 }
 0xa88   :  { %v1587_v2 = vsel %vm1586_vm15, %v1870_v19, %v1583_v30  ;;  %v1590_v41 = vmul.f32 %v1872_v49, %v1589_v31 }
 0xa89   :  { %v1599_v48 = vmul.f32 %v1587_v2, %v3031_v6 }
 0xa8a   :  { %v1591_v26 = vmul.f32 0.5, %v1590_v41 }
 0xa8b   :  { %v1603_v52 = vmul.f32 %v1824_v32, %v1599_v48 }
 0xa8c   :  { %v1592_v51 = vsub.f32 1.5, %v1591_v26 }
 0xa8d   :  { %v1607_v57 = vadd.f32 %v1825_v55, %v1603_v52 }
 0xa8e   :  { %v1593_v53 = vmul.f32 %v1872_v49, %v1592_v51 }
 0xa8f   :  { %v1609_v60 = vadd.f32 %v1607_v57, %v1606_v29 }
 0xa90   :  { %v1597_v56 = vsel %vm1596_vm5, %v1872_v49, %v1593_v53 }
 0xa91   :  { %v1600_v59 = vmul.f32 %v1597_v56, %v3036_v35  ;;  %v1828_v35 = vld [vmem:[%s3107_s2 + $0x90] ss:$0 sm:$0xff]  ;;  %s1920_s2 = smov [#allocation2]  }
 0xa92   :  { %s1719_s30 = sshll.u32 %s1920_s2, 4  ;;  %s1720_s30 = int_to_ptr.vmem [resolvable:$true] %s1719_s30 }
 0xa93   :  { %v1604_v61 = vmul.f32 %v1824_v32, %v1600_v59 }
 0xa95   :  { %v1608_v63 = vadd.f32 %v1825_v55, %v1604_v61 }
 0xa97   :  { %v1610_v0 = vadd.f32 %v1609_v60, %v1608_v63 }
 0xa99   :  { %v1611_v62 = vmul.f32 0.33333334, %v1610_v0 }
 0xa9b   :  { %1804 = vmatmul.msk.f32.vlgmr.msrb.gmra.mxu2 %vm166_vm2, %v1611_v62 }
 0xb1e   :  { %v1646_v5 = vpop.f32.mrf.mxu2 }
 0xb1f   :  { %v1647_v6 = vadd.f32 %v1826_v1, %v1646_v5 }
 0xb21   :  { %1873 = vtanh.f32 %v1647_v6 }
 0xb27   :  { %v1874_v33 = vpop.eup %1873 }
 0xb28   :  { %v1652_v34 = vmul.f32 %v1874_v33, %v1827_v7 }
 0xb2a   :  { %1805 = vmatmul.msk.f32.vlgmr.msrb.gmra.mxu0 %vm166_vm2, %v1652_v34 }
 0xba7   :  { %v1675_v36 = vpop.f32.mrf.mxu0 }
 0xba8   :  { %v1676_v37 = vadd.f32 %v1828_v35, %v1675_v36 }
 0xbaa   :  { %v1678_v38 = vsel %vm166_vm2, %v1676_v37, -inf }
 0xbab   :  { %1679 = vmax.xlane.f32.xlu2 %v1678_v38 }
 0xc1e   :  { %v1680_v58 = vpop.xlane.xlu2 %1679 }
 0xc1f   :  { %v1681_v39 = vsub.f32 %v1676_v37, %v1680_v58 }
 0xc21   :  { %v1682_v42 = vmul.f32 1.442695, %v1681_v39 }
 0xc23   :  { %1875 = vpow2.f32 %v1682_v42 }
 0xc29   :  { %v1876_v43 = vpop.eup %1875 }
 0xc2a   :  { %v1684_v44 = vsel %vm166_vm2, %v1876_v43, 0.0 }
 0xc2b   :  { %1685 = vadd.xlane.f32.xlu0 %v1684_v44 }
 0xc9e   :  { %v1686_v9 = vpop.xlane.xlu0 %1685 }
 0xc9f   :  { %v1687_v11 = vmul.f32 0.03125, %v1686_v9 }
 0xca1   :  { %1877 = vrcp.f32 %v1687_v11  ;;  %v1699_v8 = vand.u32 2147483648, %v1687_v11  ;;  %v1697_v46 = vand.u32 2147483647, %v1687_v11  ;;  %vm1693_vm7 = vweird.f32 %v1687_v11 }
 0xca3   :  { %v1700_v14 = vor.u32 1.1754944e-38, %v1699_v8  ;;  %vm1698_vm9 = vcmp.eq.f32.partialorder %v1697_v46, 8.507059e+37 }
 0xca7   :  { %v1878_v47 = vpop.eup %1877 }
 0xca8   :  { %v1689_v10 = vmul.f32 %v1878_v47, %v1687_v11  ;;  %vm1694_vm6 = vweird.f32 %v1878_v47 }
 0xca9   :  { %vm1695_vm8 = vmor %vm1693_vm7, %vm1694_vm6 }
 0xcaa   :  { %v1690_v45 = vsub.f32 1.0, %v1689_v10 }
 0xcac   :  { %v1691_v12 = vmul.f32 %v1878_v47, %v1690_v45 }
 0xcae   :  { %v1692_v13 = vadd.f32 %v1878_v47, %v1691_v12 }
 0xcb0   :  { %v1696_v15 = vsel %vm1695_vm8, %v1878_v47, %v1692_v13 }
 0xcb1   :  { %v1701_v16 = vsel %vm1698_vm9, %v1700_v14, %v1696_v15 }
 0xcb2   :  { %v1702_v17 = vmul.f32 %v1876_v43, %v1701_v16 }
 0xcb4   :  { %v1703_v18 = vmul.f32 %v1702_v17, %v1611_v62 }
 0xcb6   :  { %1705 = vrot.lane.b32.xlu1 %v1703_v18, %s1919_s13 }
 0xcbe   :  { %1709 = vrot.lane.b32.xlu1 %v1703_v18, %s1918_s12 }
 0xd28   :  { %v1706_v20 = vpop.permute.xlu1 %1705 }
 0xd29   :  { %v1708_v4 = vadd.f32 %v1706_v20, %v1703_v18 }
 0xd30   :  { %v1710_v22 = vpop.permute.xlu1 %1709 }
 0xd31   :  { %v1712_v19 = vadd.f32 %v1710_v22, %v1708_v4 }
 0xd33   :  { %1713 = vst.msk [vmem:[#allocation2] sm:$0xff] %vm754_vm0, %v1712_v19 }
 0xd34   :  { %1724 = dma.vmem_to_hbm [thread:$0]  %s1720_s30, 128, %s1722_s3, [#allocation3]  }
 0xd35   :  { %1915 = dma.done.wait [#allocation3], 128  }
 0xd36   :  { %1916 = vsyncadd [#allocation3], 4294967168 }
 0xd37   :  { %1729 = vsyncpa [#allocation3], 1 }

</bundles_post_ra>
